<compile_context>
chip_gen: v7x
topology: tpu7x:2x2x1
jax: 0.10.0
libtpu: 0.0.40
codegen_flags: <defaults>
</compile_context>

<pallas_src>
import functools

import jax
import jax.numpy as jnp
import numpy as np
from jax import lax
from jax.experimental import pallas as pl
from jax.experimental.pallas import tpu as pltpu


# ------------------------------ tiling heuristics ----------------------------------

def _pick_batch_block(n):
    """Largest batch block that (a) divides n, (b) keeps >= 8 rows (one sublane tile)
    per block so the per-step matmul doesn't starve the MXU, and (c) yields >= 2 blocks
    when possible (v7x megacore sharding + real input/output pipelining)."""
    if n < 16 or n % 8 != 0:
        return n
    blk = (n // 2 // 8) * 8
    while n % blk:
        blk -= 8
    return max(blk, 8)


def _vmem_limit_bytes(t, nb, D, H, L):
    """VMEM budget derived from the actual per-block footprint (instead of a hard-coded
    constant).  Clamped to 64 MiB so the hint is valid on v7x as well as v5e/v6e."""
    G = 3 * H
    blk = (t * nb * D * 4          # x block (f32)
           + t * nb * H * 4        # y block (f32)
           + 2 * L * nb * H * 4    # h0 + hT blocks (f32)
           + t * nb * G * 4        # gi scratch (f32)
           + t * nb * H * 2)       # inter-layer activation scratch (bf16)
    w = (D * G + (2 * L - 1) * H * G) * 2 + L * (G + H) * 4 + 2 * D * 4
    need = 2 * blk + 2 * w + (4 << 20)      # 2x: BlockSpec double buffering + headroom
    return int(min(max(need, 32 << 20), 64 << 20))


# --------------------- fused LN + multi-layer GRU stack kernel ----------------------

def _grudet_kernel(num_layers, t, H, x_ref, g_ref, b_ref, h0_ref, *refs):
    # x_ref : (t, nb, D) f32  time-major [obs ; act_emb] block
    # g_ref : (1, D) f32 LN gamma        b_ref : (1, D) f32 LN beta
    # h0_ref: (L, nb, H) f32 initial hidden states
    # per layer l (4 refs each): wih_l^T (in_dim,3H) bf16, bgi_l (1,3H) f32,
    #                            whh_l^T (H,3H) bf16,       bhn_l (1,H) f32
    # outputs: y (t, nb, H) f32, hT (L, nb, H) f32
    # scratch: gi_scr (t, nb, 3H) f32, y_scr (t, nb, H) bf16
    n_w = 4 * num_layers
    w_refs = refs[:n_w]
    y_ref, hT_ref = refs[n_w], refs[n_w + 1]
    gi_scr, y_scr = refs[n_w + 2], refs[n_w + 3]

    wih = [w_refs[4 * l + 0] for l in range(num_layers)]
    bgi = [w_refs[4 * l + 1] for l in range(num_layers)]
    whh = [w_refs[4 * l + 2] for l in range(num_layers)]
    bhn = [w_refs[4 * l + 3] for l in range(num_layers)]

    nb = x_ref.shape[1]
    D = x_ref.shape[2]
    G = 3 * H
    unroll = min(t, 8)                       # bounded unroll (LLO visibility, no blow-up)

    for l in range(num_layers):
        if l == 0:
            # Fused LayerNorm + layer-0 input-to-gates GEMM over ALL timesteps at once
            # (one (t*nb, D) x (D, 3H) MXU matmul) — gi never touches HBM.
            x = x_ref[...].astype(jnp.float32).reshape(t * nb, D)
            mu = jnp.mean(x, axis=-1, keepdims=True)
            xc = x - mu
            var = jnp.mean(xc * xc, axis=-1, keepdims=True)
            xn = xc * lax.rsqrt(var + 1e-5) * g_ref[...] + b_ref[...]
            lhs = xn.astype(wih[0].dtype)
        else:
            # Batched input-to-gates GEMM on the bf16 VMEM-resident prev-layer output.
            lhs = y_scr[...].reshape(t * nb, H)
        gl = jnp.dot(lhs, wih[l][...], preferred_element_type=jnp.float32) + bgi[l][...]
        gi_scr[...] = gl.reshape(t, nb, G)

        whh_l = whh[l][...]                  # (H, 3H) bf16, stays resident in VMEM
        bhn_l = bhn[l][...]                  # (1, H)  f32
        h_init = h0_ref[l].astype(jnp.float32)
        last = (l == num_layers - 1)

        def step(ti, h_prev, _last=last, _whh=whh_l, _bhn=bhn_l):
            gi_t = gi_scr[ti]                # (nb, 3H) f32, leading-axis dynamic index
            gh = jnp.dot(h_prev.astype(_whh.dtype), _whh,
                         preferred_element_type=jnp.float32)
            r = jax.nn.sigmoid(gi_t[:, 0:H] + gh[:, 0:H])
            z = jax.nn.sigmoid(gi_t[:, H:2 * H] + gh[:, H:2 * H])
            ng = jnp.tanh(gi_t[:, 2 * H:] + r * (gh[:, 2 * H:] + _bhn))
            h_new = (1.0 - z) * ng + z * h_prev
            if _last:
                y_ref[ti] = h_new.astype(y_ref.dtype)    # direct per-step output store
            else:
                y_scr[ti] = h_new.astype(y_scr.dtype)    # bf16 inter-layer activation
            return h_new

        h_fin = lax.fori_loop(0, t, step, h_init, unroll=unroll)
        hT_ref[l] = h_fin.astype(hT_ref.dtype)           # written once per layer


def grudet_stack_pallas(x_tm, gamma2, beta2, h0, layers, num_layers):
    t, n, D = x_tm.shape
    H = layers[0]["whh_t"].shape[0]
    G = 3 * H
    nb = _pick_batch_block(n)
    n_blocks = n // nb

    operands = [x_tm, gamma2, beta2, h0.astype(jnp.float32)]
    in_specs = [
        pl.BlockSpec((t, nb, D), lambda i: (0, i, 0)),
        pl.BlockSpec((1, D), lambda i: (0, 0)),
        pl.BlockSpec((1, D), lambda i: (0, 0)),
        pl.BlockSpec((num_layers, nb, H), lambda i: (0, i, 0)),
    ]
    for l in range(num_layers):
        ly = layers[l]
        in_dim = D if l == 0 else H
        operands += [ly["wih_t"], ly["bgi"], ly["whh_t"], ly["bhn"]]
        in_specs += [
            pl.BlockSpec((in_dim, G), lambda i: (0, 0)),
            pl.BlockSpec((1, G), lambda i: (0, 0)),
            pl.BlockSpec((H, G), lambda i: (0, 0)),
            pl.BlockSpec((1, H), lambda i: (0, 0)),
        ]

    kernel = functools.partial(_grudet_kernel, num_layers, t, H)
    y_tm, hT = pl.pallas_call(
        kernel,
        out_shape=(
            jax.ShapeDtypeStruct((t, n, H), jnp.float32),
            jax.ShapeDtypeStruct((num_layers, n, H), jnp.float32),
        ),
        grid=(n_blocks,),
        in_specs=in_specs,
        out_specs=(
            pl.BlockSpec((t, nb, H), lambda i: (0, i, 0)),
            pl.BlockSpec((num_layers, nb, H), lambda i: (0, i, 0)),
        ),
        scratch_shapes=[
            pltpu.VMEM((t, nb, G), jnp.float32),    # per-layer gi (VMEM only, no HBM)
            pltpu.VMEM((t, nb, H), jnp.bfloat16),   # bf16 inter-layer activation
        ],
        compiler_params=pltpu.CompilerParams(
            dimension_semantics=("parallel",),       # batch blocks are independent
            vmem_limit_bytes=_vmem_limit_bytes(t, nb, D, H, num_layers),
        ),
    )(*operands)
    return y_tm, hT


# --------------------------------- params ----------------------------------------

def init_params(key, action_size, hid_dim, num_layers):
    """Raw parameters in PyTorch nn.GRU / nn.LayerNorm layout."""
    act_dim = hid_dim // 4
    obs_act_dim = hid_dim + act_dim
    keys = jax.random.split(key, 2 + 4 * num_layers)
    params = {
        "emb": jax.random.normal(keys[0], (action_size, act_dim), jnp.float32),
        "ln_gamma": jnp.ones((obs_act_dim,), jnp.float32),
        "ln_beta": jnp.zeros((obs_act_dim,), jnp.float32),
        "gru": [],
    }
    k = 1.0 / np.sqrt(hid_dim)
    for l in range(num_layers):
        in_dim = obs_act_dim if l == 0 else hid_dim
        kk = keys[2 + 4 * l: 2 + 4 * (l + 1)]
        w_ih = jax.random.uniform(kk[0], (3 * hid_dim, in_dim), jnp.float32, -k, k)
        w_hh = jax.random.uniform(kk[1], (3 * hid_dim, hid_dim), jnp.float32, -k, k)
        b_ih = jax.random.uniform(kk[2], (3 * hid_dim,), jnp.float32, -k, k)
        b_hh = jax.random.uniform(kk[3], (3 * hid_dim,), jnp.float32, -k, k)
        params["gru"].append((w_ih, w_hh, b_ih, b_hh))
    return params


def prepare_params(raw):
    """One-time (init-time) transform: pre-transpose weights, cast to bf16,
    pre-fold the r/z gate biases into the gi bias.  bf16 MXU operands (f32 accumulation
    and f32 gate math) are a deliberate precision trade-off vs the f32 reference."""
    D = raw["ln_gamma"].shape[0]
    prep = {
        "emb": raw["emb"],
        "ln_gamma": raw["ln_gamma"].reshape(1, D).astype(jnp.float32),
        "ln_beta": raw["ln_beta"].reshape(1, D).astype(jnp.float32),
        "layers": [],
    }
    for (w_ih, w_hh, b_ih, b_hh) in raw["gru"]:
        H = w_hh.shape[1]
        bgi = jnp.concatenate([b_ih[:2 * H] + b_hh[:2 * H], b_ih[2 * H:]])
        prep["layers"].append({
            "wih_t": jnp.asarray(w_ih.T, jnp.bfloat16),      # (in_dim, 3H)
            "whh_t": jnp.asarray(w_hh.T, jnp.bfloat16),      # (H, 3H)
            "bgi": bgi.reshape(1, 3 * H).astype(jnp.float32),
            "bhn": b_hh[2 * H:].reshape(1, H).astype(jnp.float32),
        })
    return prep


# ------------------------------- GRUDet forward -----------------------------------

@functools.partial(jax.jit, static_argnames=("num_layers",))
def grudet_forward(prep, x, a, h, num_layers):
    """x: (n, t, d=hid); a: (n, t) int32; h: (num_layers, n, hid)."""
    # Embedding lookup + concat (plain JAX glue).  The concat is built directly in
    # time-major order so the (n,t)->(t,n) transpose folds into the (unavoidable)
    # concat materialization instead of being a separate HBM pass.
    a_emb_tm = jnp.take(prep["emb"], a.T, axis=0)             # (t, n, act_dim)
    x_tm = jnp.swapaxes(x, 0, 1)                              # fused into the concat
    xa_tm = jnp.concatenate([x_tm, a_emb_tm], axis=-1)        # (t, n, D)

    y_tm, h_out = grudet_stack_pallas(xa_tm, prep["ln_gamma"], prep["ln_beta"],
                                      h, prep["layers"], num_layers)
    return jnp.swapaxes(y_tm, 0, 1), h_out                    # (n, t, hid), (L, n, hid)


# ------------------------------ pure-JAX reference --------------------------------

def grudet_reference(params, x, a, h, num_layers):
    a_emb = jnp.take(params["emb"], a, axis=0)
    xa = jnp.concatenate([x, a_emb], axis=-1)
    mu = jnp.mean(xa, axis=-1, keepdims=True)
    var = jnp.mean((xa - mu) ** 2, axis=-1, keepdims=True)
    xa = (xa - mu) * lax.rsqrt(var + 1e-5) * params["ln_gamma"] + params["ln_beta"]

    out = xa
    h_finals = []
    for l in range(num_layers):
        w_ih, w_hh, b_ih, b_hh = params["gru"][l]
        H = w_hh.shape[1]

        def step(hp, xt):
            gi = xt @ w_ih.T + b_ih
            gh = hp @ w_hh.T + b_hh
            r = jax.nn.sigmoid(gi[:, :H] + gh[:, :H])
            z = jax.nn.sigmoid(gi[:, H:2 * H] + gh[:, H:2 * H])
            ng = jnp.tanh(gi[:, 2 * H:] + r * gh[:, 2 * H:])
            hn = (1.0 - z) * ng + z * hp
            return hn, hn

        hT, ys = lax.scan(step, h[l], jnp.swapaxes(out, 0, 1))
        out = jnp.swapaxes(ys, 0, 1)
        h_finals.append(hT)
    return out, jnp.stack(h_finals, axis=0)


# ------------------------------------ main -----------------------------------------

if __name__ == "__main__":
    action_size = 6
    hid_dim = 32
    num_layers = 2
    n, t = 2, 8

    key = jax.random.PRNGKey(0)
    kp, kx, ka, kh = jax.random.split(key, 4)
    raw_params = init_params(kp, action_size, hid_dim, num_layers)
    prep_params = prepare_params(raw_params)                  # one-time, outside jit

    x = jax.random.normal(kx, (n, t, hid_dim), jnp.float32)
    a = jax.random.randint(ka, (n, t), 0, action_size, jnp.int32)
    h0 = jax.random.normal(kh, (num_layers, n, hid_dim), jnp.float32)

    y, h_out = grudet_forward(prep_params, x, a, h0, num_layers)
    y = jax.block_until_ready(y)
    h_out = jax.block_until_ready(h_out)

    assert y.shape == (n, t, hid_dim), y.shape
    assert h_out.shape == (num_layers, n, hid_dim), h_out.shape

    y_ref, h_ref = grudet_reference(raw_params, x, a, h0, num_layers)
    # bf16 MXU operands (f32 accumulation / f32 gate math) => modest tolerance.
    np.testing.assert_allclose(np.asarray(y), np.asarray(y_ref), atol=3e-2, rtol=3e-2)
    np.testing.assert_allclose(np.asarray(h_out), np.asarray(h_ref), atol=3e-2, rtol=3e-2)

    print("KERNEL_OK")
</pallas_src>

<mosaic_0001>
module attributes {stable_mosaic.version = 11 : i64} {
  func.func @_grudet_kernel(%arg0: i32, %arg1: memref<8x2x40xf32, #tpu.memory_space<vmem>>, %arg2: memref<1x40xf32, #tpu.memory_space<vmem>>, %arg3: memref<1x40xf32, #tpu.memory_space<vmem>>, %arg4: memref<2x2x32xf32, #tpu.memory_space<vmem>>, %arg5: memref<40x96xbf16, #tpu.memory_space<vmem>>, %arg6: memref<1x96xf32, #tpu.memory_space<vmem>>, %arg7: memref<32x96xbf16, #tpu.memory_space<vmem>>, %arg8: memref<1x32xf32, #tpu.memory_space<vmem>>, %arg9: memref<32x96xbf16, #tpu.memory_space<vmem>>, %arg10: memref<1x96xf32, #tpu.memory_space<vmem>>, %arg11: memref<32x96xbf16, #tpu.memory_space<vmem>>, %arg12: memref<1x32xf32, #tpu.memory_space<vmem>>, %arg13: memref<8x2x32xf32, #tpu.memory_space<vmem>>, %arg14: memref<2x2x32xf32, #tpu.memory_space<vmem>>, %arg15: memref<8x2x96xf32, #tpu.memory_space<vmem>>, %arg16: memref<8x2x32xbf16, #tpu.memory_space<vmem>>) attributes {dimension_semantics = [#tpu.dimension_semantics<parallel>], iteration_bounds = array<i64: 1>, scalar_prefetch = 0 : i64, scratch_operands = 2 : i64, tpu.core_type = #tpu.core_type<tc>, window_params = [{transform_indices = @transform_0, window_bounds = array<i64: 8, 2, 40>}, {pipeline_mode = #tpu.pipeline_mode<synchronous>, transform_indices = @transform_1, window_bounds = array<i64: 1, 40>}, {pipeline_mode = #tpu.pipeline_mode<synchronous>, transform_indices = @transform_2, window_bounds = array<i64: 1, 40>}, {transform_indices = @transform_3, window_bounds = array<i64: 2, 2, 32>}, {pipeline_mode = #tpu.pipeline_mode<synchronous>, transform_indices = @transform_4, window_bounds = array<i64: 40, 96>}, {pipeline_mode = #tpu.pipeline_mode<synchronous>, transform_indices = @transform_5, window_bounds = array<i64: 1, 96>}, {pipeline_mode = #tpu.pipeline_mode<synchronous>, transform_indices = @transform_6, window_bounds = array<i64: 32, 96>}, {pipeline_mode = #tpu.pipeline_mode<synchronous>, transform_indices = @transform_7, window_bounds = array<i64: 1, 32>}, {pipeline_mode = #tpu.pipeline_mode<synchronous>, transform_indices = @transform_8, window_bounds = array<i64: 32, 96>}, {pipeline_mode = #tpu.pipeline_mode<synchronous>, transform_indices = @transform_9, window_bounds = array<i64: 1, 96>}, {pipeline_mode = #tpu.pipeline_mode<synchronous>, transform_indices = @transform_10, window_bounds = array<i64: 32, 96>}, {pipeline_mode = #tpu.pipeline_mode<synchronous>, transform_indices = @transform_11, window_bounds = array<i64: 1, 32>}, {transform_indices = @transform_12, window_bounds = array<i64: 8, 2, 32>}, {transform_indices = @transform_13, window_bounds = array<i64: 2, 2, 32>}]} {
    %c0 = arith.constant 0 : index
    %c0_0 = arith.constant 0 : index
    %c0_1 = arith.constant 0 : index
    %0 = vector.load %arg1[%c0, %c0_0, %c0_1] : memref<8x2x40xf32, #tpu.memory_space<vmem>>, vector<8x2x40xf32>
    %1 = vector.shape_cast %0 : vector<8x2x40xf32> to vector<16x40xf32>
    %cst = arith.constant dense<0.000000e+00> : vector<16xf32>
    %2 = vector.multi_reduction <add>, %1, %cst [1] : vector<16x40xf32> to vector<16xf32>
    %3 = vector.shape_cast %2 : vector<16xf32> to vector<16x1xf32>
    %cst_2 = arith.constant 4.000000e+01 : f32
    %4 = vector.broadcast %cst_2 : f32 to vector<16x1xf32>
    %5 = arith.divf %3, %4 : vector<16x1xf32>
    %6 = vector.broadcast %5 : vector<16x1xf32> to vector<16x40xf32>
    %7 = arith.subf %1, %6 : vector<16x40xf32>
    %8 = arith.mulf %7, %7 : vector<16x40xf32>
    %cst_3 = arith.constant dense<0.000000e+00> : vector<16xf32>
    %9 = vector.multi_reduction <add>, %8, %cst_3 [1] : vector<16x40xf32> to vector<16xf32>
    %10 = vector.shape_cast %9 : vector<16xf32> to vector<16x1xf32>
    %cst_4 = arith.constant 4.000000e+01 : f32
    %11 = vector.broadcast %cst_4 : f32 to vector<16x1xf32>
    %12 = arith.divf %10, %11 : vector<16x1xf32>
    %cst_5 = arith.constant 9.99999974E-6 : f32
    %13 = vector.broadcast %cst_5 : f32 to vector<16x1xf32>
    %14 = arith.addf %12, %13 : vector<16x1xf32>
    %15 = math.rsqrt %14 : vector<16x1xf32>
    %16 = vector.broadcast %15 : vector<16x1xf32> to vector<16x40xf32>
    %17 = arith.mulf %7, %16 : vector<16x40xf32>
    %c0_6 = arith.constant 0 : index
    %c0_7 = arith.constant 0 : index
    %18 = vector.load %arg2[%c0_6, %c0_7] : memref<1x40xf32, #tpu.memory_space<vmem>>, vector<1x40xf32>
    %19 = vector.broadcast %18 : vector<1x40xf32> to vector<16x40xf32>
    %20 = arith.mulf %17, %19 : vector<16x40xf32>
    %c0_8 = arith.constant 0 : index
    %c0_9 = arith.constant 0 : index
    %21 = vector.load %arg3[%c0_8, %c0_9] : memref<1x40xf32, #tpu.memory_space<vmem>>, vector<1x40xf32>
    %22 = vector.broadcast %21 : vector<1x40xf32> to vector<16x40xf32>
    %23 = arith.addf %20, %22 : vector<16x40xf32>
    %24 = arith.truncf %23 : vector<16x40xf32> to vector<16x40xbf16>
    %c0_10 = arith.constant 0 : index
    %c0_11 = arith.constant 0 : index
    %25 = vector.load %arg5[%c0_10, %c0_11] : memref<40x96xbf16, #tpu.memory_space<vmem>>, vector<40x96xbf16>
    %cst_12 = arith.constant dense<0.000000e+00> : vector<16x96xf32>
    %26 = tpu.matmul %24, %25, %cst_12 {dimension_numbers = #tpu.dot_dimension_numbers<[1], [0], [0], [1], [0, 0, 1, 1], [], []>} : vector<16x40xbf16>, vector<40x96xbf16>, vector<16x96xf32> -> vector<16x96xf32>
    %c0_13 = arith.constant 0 : index
    %c0_14 = arith.constant 0 : index
    %27 = vector.load %arg6[%c0_13, %c0_14] : memref<1x96xf32, #tpu.memory_space<vmem>>, vector<1x96xf32>
    %28 = vector.broadcast %27 : vector<1x96xf32> to vector<16x96xf32>
    %29 = arith.addf %26, %28 : vector<16x96xf32>
    %30 = vector.shape_cast %29 : vector<16x96xf32> to vector<8x2x96xf32>
    %c0_15 = arith.constant 0 : index
    %c0_16 = arith.constant 0 : index
    %c0_17 = arith.constant 0 : index
    %31 = vector.load %arg15[%c0_15, %c0_16, %c0_17] : memref<8x2x96xf32, #tpu.memory_space<vmem>>, vector<8x2x96xf32>
    tpu.vector_store %arg15[%c0_15, %c0_16, %c0_17], %30 {strides = array<i32>} : memref<8x2x96xf32, #tpu.memory_space<vmem>>, vector<8x2x96xf32>,
    %c0_18 = arith.constant 0 : index
    %c0_19 = arith.constant 0 : index
    %32 = vector.load %arg7[%c0_18, %c0_19] : memref<32x96xbf16, #tpu.memory_space<vmem>>, vector<32x96xbf16>
    %c0_20 = arith.constant 0 : index
    %c0_21 = arith.constant 0 : index
    %33 = vector.load %arg8[%c0_20, %c0_21] : memref<1x32xf32, #tpu.memory_space<vmem>>, vector<1x32xf32>
    %c0_22 = arith.constant 0 : index
    %c0_23 = arith.constant 0 : index
    %c0_24 = arith.constant 0 : index
    %34 = vector.load %arg4[%c0_22, %c0_23, %c0_24] : memref<2x2x32xf32, #tpu.memory_space<vmem>>, vector<1x2x32xf32>
    %35 = vector.shape_cast %34 : vector<1x2x32xf32> to vector<2x32xf32>
    %c0_i32 = arith.constant 0 : i32
    %36 = arith.index_cast %c0_i32 : i32 to index
    %c0_25 = arith.constant 0 : index
    %c0_26 = arith.constant 0 : index
    %37 = vector.load %arg15[%36, %c0_25, %c0_26] : memref<8x2x96xf32, #tpu.memory_space<vmem>>, vector<1x2x96xf32>
    %38 = vector.shape_cast %37 : vector<1x2x96xf32> to vector<2x96xf32>
    %39 = arith.truncf %35 : vector<2x32xf32> to vector<2x32xbf16>
    %cst_27 = arith.constant dense<0.000000e+00> : vector<2x96xf32>
    %40 = tpu.matmul %39, %32, %cst_27 {dimension_numbers = #tpu.dot_dimension_numbers<[1], [0], [0], [1], [0, 0, 1, 1], [], []>} : vector<2x32xbf16>, vector<32x96xbf16>, vector<2x96xf32> -> vector<2x96xf32>
    %41 = vector.extract_strided_slice %38 {offsets = [0, 0], sizes = [2, 32], strides = [1, 1]} : vector<2x96xf32> to vector<2x32xf32>
    %42 = vector.extract_strided_slice %40 {offsets = [0, 0], sizes = [2, 32], strides = [1, 1]} : vector<2x96xf32> to vector<2x32xf32>
    %43 = arith.addf %41, %42 : vector<2x32xf32>
    %44 = arith.negf %43 : vector<2x32xf32>
    %45 = math.exp %44 : vector<2x32xf32>
    %cst_28 = arith.constant 1.000000e+00 : f32
    %46 = vector.broadcast %cst_28 : f32 to vector<2x32xf32>
    %47 = arith.addf %46, %45 : vector<2x32xf32>
    %48 = arith.divf %46, %47 : vector<2x32xf32>
    %49 = vector.extract_strided_slice %38 {offsets = [0, 32], sizes = [2, 32], strides = [1, 1]} : vector<2x96xf32> to vector<2x32xf32>
    %50 = vector.extract_strided_slice %40 {offsets = [0, 32], sizes = [2, 32], strides = [1, 1]} : vector<2x96xf32> to vector<2x32xf32>
    %51 = arith.addf %49, %50 : vector<2x32xf32>
    %52 = arith.negf %51 : vector<2x32xf32>
    %53 = math.exp %52 : vector<2x32xf32>
    %cst_29 = arith.constant 1.000000e+00 : f32
    %54 = vector.broadcast %cst_29 : f32 to vector<2x32xf32>
    %55 = arith.addf %54, %53 : vector<2x32xf32>
    %56 = arith.divf %54, %55 : vector<2x32xf32>
    %57 = vector.extract_strided_slice %38 {offsets = [0, 64], sizes = [2, 32], strides = [1, 1]} : vector<2x96xf32> to vector<2x32xf32>
    %58 = vector.extract_strided_slice %40 {offsets = [0, 64], sizes = [2, 32], strides = [1, 1]} : vector<2x96xf32> to vector<2x32xf32>
    %59 = vector.broadcast %33 : vector<1x32xf32> to vector<2x32xf32>
    %60 = arith.addf %58, %59 : vector<2x32xf32>
    %61 = arith.mulf %48, %60 : vector<2x32xf32>
    %62 = arith.addf %57, %61 : vector<2x32xf32>
    %63 = math.tanh %62 : vector<2x32xf32>
    %cst_30 = arith.constant 1.000000e+00 : f32
    %64 = vector.broadcast %cst_30 : f32 to vector<2x32xf32>
    %65 = arith.subf %64, %56 : vector<2x32xf32>
    %66 = arith.mulf %65, %63 : vector<2x32xf32>
    %67 = arith.mulf %56, %35 : vector<2x32xf32>
    %68 = arith.addf %66, %67 : vector<2x32xf32>
    %69 = arith.truncf %68 : vector<2x32xf32> to vector<2x32xbf16>
    %70 = arith.index_cast %c0_i32 : i32 to index
    %c0_31 = arith.constant 0 : index
    %c0_32 = arith.constant 0 : index
    %71 = vector.load %arg16[%70, %c0_31, %c0_32] : memref<8x2x32xbf16, #tpu.memory_space<vmem>>, vector<1x2x32xbf16>
    %72 = vector.shape_cast %71 : vector<1x2x32xbf16> to vector<2x32xbf16>
    %73 = vector.shape_cast %69 : vector<2x32xbf16> to vector<1x2x32xbf16>
    tpu.vector_store %arg16[%70, %c0_31, %c0_32], %73 {strides = array<i32>} : memref<8x2x32xbf16, #tpu.memory_space<vmem>>, vector<1x2x32xbf16>,
    %c1_i32 = arith.constant 1 : i32
    %74 = arith.index_cast %c1_i32 : i32 to index
    %c0_33 = arith.constant 0 : index
    %c0_34 = arith.constant 0 : index
    %75 = vector.load %arg15[%74, %c0_33, %c0_34] : memref<8x2x96xf32, #tpu.memory_space<vmem>>, vector<1x2x96xf32>
    %76 = vector.shape_cast %75 : vector<1x2x96xf32> to vector<2x96xf32>
    %77 = arith.truncf %68 : vector<2x32xf32> to vector<2x32xbf16>
    %cst_35 = arith.constant dense<0.000000e+00> : vector<2x96xf32>
    %78 = tpu.matmul %77, %32, %cst_35 {dimension_numbers = #tpu.dot_dimension_numbers<[1], [0], [0], [1], [0, 0, 1, 1], [], []>} : vector<2x32xbf16>, vector<32x96xbf16>, vector<2x96xf32> -> vector<2x96xf32>
    %79 = vector.extract_strided_slice %76 {offsets = [0, 0], sizes = [2, 32], strides = [1, 1]} : vector<2x96xf32> to vector<2x32xf32>
    %80 = vector.extract_strided_slice %78 {offsets = [0, 0], sizes = [2, 32], strides = [1, 1]} : vector<2x96xf32> to vector<2x32xf32>
    %81 = arith.addf %79, %80 : vector<2x32xf32>
    %82 = arith.negf %81 : vector<2x32xf32>
    %83 = math.exp %82 : vector<2x32xf32>
    %cst_36 = arith.constant 1.000000e+00 : f32
    %84 = vector.broadcast %cst_36 : f32 to vector<2x32xf32>
    %85 = arith.addf %84, %83 : vector<2x32xf32>
    %86 = arith.divf %84, %85 : vector<2x32xf32>
    %87 = vector.extract_strided_slice %76 {offsets = [0, 32], sizes = [2, 32], strides = [1, 1]} : vector<2x96xf32> to vector<2x32xf32>
    %88 = vector.extract_strided_slice %78 {offsets = [0, 32], sizes = [2, 32], strides = [1, 1]} : vector<2x96xf32> to vector<2x32xf32>
    %89 = arith.addf %87, %88 : vector<2x32xf32>
    %90 = arith.negf %89 : vector<2x32xf32>
    %91 = math.exp %90 : vector<2x32xf32>
    %cst_37 = arith.constant 1.000000e+00 : f32
    %92 = vector.broadcast %cst_37 : f32 to vector<2x32xf32>
    %93 = arith.addf %92, %91 : vector<2x32xf32>
    %94 = arith.divf %92, %93 : vector<2x32xf32>
    %95 = vector.extract_strided_slice %76 {offsets = [0, 64], sizes = [2, 32], strides = [1, 1]} : vector<2x96xf32> to vector<2x32xf32>
    %96 = vector.extract_strided_slice %78 {offsets = [0, 64], sizes = [2, 32], strides = [1, 1]} : vector<2x96xf32> to vector<2x32xf32>
    %97 = vector.broadcast %33 : vector<1x32xf32> to vector<2x32xf32>
    %98 = arith.addf %96, %97 : vector<2x32xf32>
    %99 = arith.mulf %86, %98 : vector<2x32xf32>
    %100 = arith.addf %95, %99 : vector<2x32xf32>
    %101 = math.tanh %100 : vector<2x32xf32>
    %cst_38 = arith.constant 1.000000e+00 : f32
    %102 = vector.broadcast %cst_38 : f32 to vector<2x32xf32>
    %103 = arith.subf %102, %94 : vector<2x32xf32>
    %104 = arith.mulf %103, %101 : vector<2x32xf32>
    %105 = arith.mulf %94, %68 : vector<2x32xf32>
    %106 = arith.addf %104, %105 : vector<2x32xf32>
    %107 = arith.truncf %106 : vector<2x32xf32> to vector<2x32xbf16>
    %108 = arith.index_cast %c1_i32 : i32 to index
    %c0_39 = arith.constant 0 : index
    %c0_40 = arith.constant 0 : index
    %109 = vector.load %arg16[%108, %c0_39, %c0_40] : memref<8x2x32xbf16, #tpu.memory_space<vmem>>, vector<1x2x32xbf16>
    %110 = vector.shape_cast %109 : vector<1x2x32xbf16> to vector<2x32xbf16>
    %111 = vector.shape_cast %107 : vector<2x32xbf16> to vector<1x2x32xbf16>
    tpu.vector_store %arg16[%108, %c0_39, %c0_40], %111 {strides = array<i32>} : memref<8x2x32xbf16, #tpu.memory_space<vmem>>, vector<1x2x32xbf16>,
    %c2_i32 = arith.constant 2 : i32
    %112 = arith.index_cast %c2_i32 : i32 to index
    %c0_41 = arith.constant 0 : index
    %c0_42 = arith.constant 0 : index
    %113 = vector.load %arg15[%112, %c0_41, %c0_42] : memref<8x2x96xf32, #tpu.memory_space<vmem>>, vector<1x2x96xf32>
    %114 = vector.shape_cast %113 : vector<1x2x96xf32> to vector<2x96xf32>
    %115 = arith.truncf %106 : vector<2x32xf32> to vector<2x32xbf16>
    %cst_43 = arith.constant dense<0.000000e+00> : vector<2x96xf32>
    %116 = tpu.matmul %115, %32, %cst_43 {dimension_numbers = #tpu.dot_dimension_numbers<[1], [0], [0], [1], [0, 0, 1, 1], [], []>} : vector<2x32xbf16>, vector<32x96xbf16>, vector<2x96xf32> -> vector<2x96xf32>
    %117 = vector.extract_strided_slice %114 {offsets = [0, 0], sizes = [2, 32], strides = [1, 1]} : vector<2x96xf32> to vector<2x32xf32>
    %118 = vector.extract_strided_slice %116 {offsets = [0, 0], sizes = [2, 32], strides = [1, 1]} : vector<2x96xf32> to vector<2x32xf32>
    %119 = arith.addf %117, %118 : vector<2x32xf32>
    %120 = arith.negf %119 : vector<2x32xf32>
    %121 = math.exp %120 : vector<2x32xf32>
    %cst_44 = arith.constant 1.000000e+00 : f32
    %122 = vector.broadcast %cst_44 : f32 to vector<2x32xf32>
    %123 = arith.addf %122, %121 : vector<2x32xf32>
    %124 = arith.divf %122, %123 : vector<2x32xf32>
    %125 = vector.extract_strided_slice %114 {offsets = [0, 32], sizes = [2, 32], strides = [1, 1]} : vector<2x96xf32> to vector<2x32xf32>
    %126 = vector.extract_strided_slice %116 {offsets = [0, 32], sizes = [2, 32], strides = [1, 1]} : vector<2x96xf32> to vector<2x32xf32>
    %127 = arith.addf %125, %126 : vector<2x32xf32>
    %128 = arith.negf %127 : vector<2x32xf32>
    %129 = math.exp %128 : vector<2x32xf32>
    %cst_45 = arith.constant 1.000000e+00 : f32
    %130 = vector.broadcast %cst_45 : f32 to vector<2x32xf32>
    %131 = arith.addf %130, %129 : vector<2x32xf32>
    %132 = arith.divf %130, %131 : vector<2x32xf32>
    %133 = vector.extract_strided_slice %114 {offsets = [0, 64], sizes = [2, 32], strides = [1, 1]} : vector<2x96xf32> to vector<2x32xf32>
    %134 = vector.extract_strided_slice %116 {offsets = [0, 64], sizes = [2, 32], strides = [1, 1]} : vector<2x96xf32> to vector<2x32xf32>
    %135 = vector.broadcast %33 : vector<1x32xf32> to vector<2x32xf32>
    %136 = arith.addf %134, %135 : vector<2x32xf32>
    %137 = arith.mulf %124, %136 : vector<2x32xf32>
    %138 = arith.addf %133, %137 : vector<2x32xf32>
    %139 = math.tanh %138 : vector<2x32xf32>
    %cst_46 = arith.constant 1.000000e+00 : f32
    %140 = vector.broadcast %cst_46 : f32 to vector<2x32xf32>
    %141 = arith.subf %140, %132 : vector<2x32xf32>
    %142 = arith.mulf %141, %139 : vector<2x32xf32>
    %143 = arith.mulf %132, %106 : vector<2x32xf32>
    %144 = arith.addf %142, %143 : vector<2x32xf32>
    %145 = arith.truncf %144 : vector<2x32xf32> to vector<2x32xbf16>
    %146 = arith.index_cast %c2_i32 : i32 to index
    %c0_47 = arith.constant 0 : index
    %c0_48 = arith.constant 0 : index
    %147 = vector.load %arg16[%146, %c0_47, %c0_48] : memref<8x2x32xbf16, #tpu.memory_space<vmem>>, vector<1x2x32xbf16>
    %148 = vector.shape_cast %147 : vector<1x2x32xbf16> to vector<2x32xbf16>
    %149 = vector.shape_cast %145 : vector<2x32xbf16> to vector<1x2x32xbf16>
    tpu.vector_store %arg16[%146, %c0_47, %c0_48], %149 {strides = array<i32>} : memref<8x2x32xbf16, #tpu.memory_space<vmem>>, vector<1x2x32xbf16>,
    %c3_i32 = arith.constant 3 : i32
    %150 = arith.index_cast %c3_i32 : i32 to index
    %c0_49 = arith.constant 0 : index
    %c0_50 = arith.constant 0 : index
    %151 = vector.load %arg15[%150, %c0_49, %c0_50] : memref<8x2x96xf32, #tpu.memory_space<vmem>>, vector<1x2x96xf32>
    %152 = vector.shape_cast %151 : vector<1x2x96xf32> to vector<2x96xf32>
    %153 = arith.truncf %144 : vector<2x32xf32> to vector<2x32xbf16>
    %cst_51 = arith.constant dense<0.000000e+00> : vector<2x96xf32>
    %154 = tpu.matmul %153, %32, %cst_51 {dimension_numbers = #tpu.dot_dimension_numbers<[1], [0], [0], [1], [0, 0, 1, 1], [], []>} : vector<2x32xbf16>, vector<32x96xbf16>, vector<2x96xf32> -> vector<2x96xf32>
    %155 = vector.extract_strided_slice %152 {offsets = [0, 0], sizes = [2, 32], strides = [1, 1]} : vector<2x96xf32> to vector<2x32xf32>
    %156 = vector.extract_strided_slice %154 {offsets = [0, 0], sizes = [2, 32], strides = [1, 1]} : vector<2x96xf32> to vector<2x32xf32>
    %157 = arith.addf %155, %156 : vector<2x32xf32>
    %158 = arith.negf %157 : vector<2x32xf32>
    %159 = math.exp %158 : vector<2x32xf32>
    %cst_52 = arith.constant 1.000000e+00 : f32
    %160 = vector.broadcast %cst_52 : f32 to vector<2x32xf32>
    %161 = arith.addf %160, %159 : vector<2x32xf32>
    %162 = arith.divf %160, %161 : vector<2x32xf32>
    %163 = vector.extract_strided_slice %152 {offsets = [0, 32], sizes = [2, 32], strides = [1, 1]} : vector<2x96xf32> to vector<2x32xf32>
    %164 = vector.extract_strided_slice %154 {offsets = [0, 32], sizes = [2, 32], strides = [1, 1]} : vector<2x96xf32> to vector<2x32xf32>
    %165 = arith.addf %163, %164 : vector<2x32xf32>
    %166 = arith.negf %165 : vector<2x32xf32>
    %167 = math.exp %166 : vector<2x32xf32>
    %cst_53 = arith.constant 1.000000e+00 : f32
    %168 = vector.broadcast %cst_53 : f32 to vector<2x32xf32>
    %169 = arith.addf %168, %167 : vector<2x32xf32>
    %170 = arith.divf %168, %169 : vector<2x32xf32>
    %171 = vector.extract_strided_slice %152 {offsets = [0, 64], sizes = [2, 32], strides = [1, 1]} : vector<2x96xf32> to vector<2x32xf32>
    %172 = vector.extract_strided_slice %154 {offsets = [0, 64], sizes = [2, 32], strides = [1, 1]} : vector<2x96xf32> to vector<2x32xf32>
    %173 = vector.broadcast %33 : vector<1x32xf32> to vector<2x32xf32>
    %174 = arith.addf %172, %173 : vector<2x32xf32>
    %175 = arith.mulf %162, %174 : vector<2x32xf32>
    %176 = arith.addf %171, %175 : vector<2x32xf32>
    %177 = math.tanh %176 : vector<2x32xf32>
    %cst_54 = arith.constant 1.000000e+00 : f32
    %178 = vector.broadcast %cst_54 : f32 to vector<2x32xf32>
    %179 = arith.subf %178, %170 : vector<2x32xf32>
    %180 = arith.mulf %179, %177 : vector<2x32xf32>
    %181 = arith.mulf %170, %144 : vector<2x32xf32>
    %182 = arith.addf %180, %181 : vector<2x32xf32>
    %183 = arith.truncf %182 : vector<2x32xf32> to vector<2x32xbf16>
    %184 = arith.index_cast %c3_i32 : i32 to index
    %c0_55 = arith.constant 0 : index
    %c0_56 = arith.constant 0 : index
    %185 = vector.load %arg16[%184, %c0_55, %c0_56] : memref<8x2x32xbf16, #tpu.memory_space<vmem>>, vector<1x2x32xbf16>
    %186 = vector.shape_cast %185 : vector<1x2x32xbf16> to vector<2x32xbf16>
    %187 = vector.shape_cast %183 : vector<2x32xbf16> to vector<1x2x32xbf16>
    tpu.vector_store %arg16[%184, %c0_55, %c0_56], %187 {strides = array<i32>} : memref<8x2x32xbf16, #tpu.memory_space<vmem>>, vector<1x2x32xbf16>,
    %c4_i32 = arith.constant 4 : i32
    %188 = arith.index_cast %c4_i32 : i32 to index
    %c0_57 = arith.constant 0 : index
    %c0_58 = arith.constant 0 : index
    %189 = vector.load %arg15[%188, %c0_57, %c0_58] : memref<8x2x96xf32, #tpu.memory_space<vmem>>, vector<1x2x96xf32>
    %190 = vector.shape_cast %189 : vector<1x2x96xf32> to vector<2x96xf32>
    %191 = arith.truncf %182 : vector<2x32xf32> to vector<2x32xbf16>
    %cst_59 = arith.constant dense<0.000000e+00> : vector<2x96xf32>
    %192 = tpu.matmul %191, %32, %cst_59 {dimension_numbers = #tpu.dot_dimension_numbers<[1], [0], [0], [1], [0, 0, 1, 1], [], []>} : vector<2x32xbf16>, vector<32x96xbf16>, vector<2x96xf32> -> vector<2x96xf32>
    %193 = vector.extract_strided_slice %190 {offsets = [0, 0], sizes = [2, 32], strides = [1, 1]} : vector<2x96xf32> to vector<2x32xf32>
    %194 = vector.extract_strided_slice %192 {offsets = [0, 0], sizes = [2, 32], strides = [1, 1]} : vector<2x96xf32> to vector<2x32xf32>
    %195 = arith.addf %193, %194 : vector<2x32xf32>
    %196 = arith.negf %195 : vector<2x32xf32>
    %197 = math.exp %196 : vector<2x32xf32>
    %cst_60 = arith.constant 1.000000e+00 : f32
    %198 = vector.broadcast %cst_60 : f32 to vector<2x32xf32>
    %199 = arith.addf %198, %197 : vector<2x32xf32>
    %200 = arith.divf %198, %199 : vector<2x32xf32>
    %201 = vector.extract_strided_slice %190 {offsets = [0, 32], sizes = [2, 32], strides = [1, 1]} : vector<2x96xf32> to vector<2x32xf32>
    %202 = vector.extract_strided_slice %192 {offsets = [0, 32], sizes = [2, 32], strides = [1, 1]} : vector<2x96xf32> to vector<2x32xf32>
    %203 = arith.addf %201, %202 : vector<2x32xf32>
    %204 = arith.negf %203 : vector<2x32xf32>
    %205 = math.exp %204 : vector<2x32xf32>
    %cst_61 = arith.constant 1.000000e+00 : f32
    %206 = vector.broadcast %cst_61 : f32 to vector<2x32xf32>
    %207 = arith.addf %206, %205 : vector<2x32xf32>
    %208 = arith.divf %206, %207 : vector<2x32xf32>
    %209 = vector.extract_strided_slice %190 {offsets = [0, 64], sizes = [2, 32], strides = [1, 1]} : vector<2x96xf32> to vector<2x32xf32>
    %210 = vector.extract_strided_slice %192 {offsets = [0, 64], sizes = [2, 32], strides = [1, 1]} : vector<2x96xf32> to vector<2x32xf32>
    %211 = vector.broadcast %33 : vector<1x32xf32> to vector<2x32xf32>
    %212 = arith.addf %210, %211 : vector<2x32xf32>
    %213 = arith.mulf %200, %212 : vector<2x32xf32>
    %214 = arith.addf %209, %213 : vector<2x32xf32>
    %215 = math.tanh %214 : vector<2x32xf32>
    %cst_62 = arith.constant 1.000000e+00 : f32
    %216 = vector.broadcast %cst_62 : f32 to vector<2x32xf32>
    %217 = arith.subf %216, %208 : vector<2x32xf32>
    %218 = arith.mulf %217, %215 : vector<2x32xf32>
    %219 = arith.mulf %208, %182 : vector<2x32xf32>
    %220 = arith.addf %218, %219 : vector<2x32xf32>
    %221 = arith.truncf %220 : vector<2x32xf32> to vector<2x32xbf16>
    %222 = arith.index_cast %c4_i32 : i32 to index
    %c0_63 = arith.constant 0 : index
    %c0_64 = arith.constant 0 : index
    %223 = vector.load %arg16[%222, %c0_63, %c0_64] : memref<8x2x32xbf16, #tpu.memory_space<vmem>>, vector<1x2x32xbf16>
    %224 = vector.shape_cast %223 : vector<1x2x32xbf16> to vector<2x32xbf16>
    %225 = vector.shape_cast %221 : vector<2x32xbf16> to vector<1x2x32xbf16>
    tpu.vector_store %arg16[%222, %c0_63, %c0_64], %225 {strides = array<i32>} : memref<8x2x32xbf16, #tpu.memory_space<vmem>>, vector<1x2x32xbf16>,
    %c5_i32 = arith.constant 5 : i32
    %226 = arith.index_cast %c5_i32 : i32 to index
    %c0_65 = arith.constant 0 : index
    %c0_66 = arith.constant 0 : index
    %227 = vector.load %arg15[%226, %c0_65, %c0_66] : memref<8x2x96xf32, #tpu.memory_space<vmem>>, vector<1x2x96xf32>
    %228 = vector.shape_cast %227 : vector<1x2x96xf32> to vector<2x96xf32>
    %229 = arith.truncf %220 : vector<2x32xf32> to vector<2x32xbf16>
    %cst_67 = arith.constant dense<0.000000e+00> : vector<2x96xf32>
    %230 = tpu.matmul %229, %32, %cst_67 {dimension_numbers = #tpu.dot_dimension_numbers<[1], [0], [0], [1], [0, 0, 1, 1], [], []>} : vector<2x32xbf16>, vector<32x96xbf16>, vector<2x96xf32> -> vector<2x96xf32>
    %231 = vector.extract_strided_slice %228 {offsets = [0, 0], sizes = [2, 32], strides = [1, 1]} : vector<2x96xf32> to vector<2x32xf32>
    %232 = vector.extract_strided_slice %230 {offsets = [0, 0], sizes = [2, 32], strides = [1, 1]} : vector<2x96xf32> to vector<2x32xf32>
    %233 = arith.addf %231, %232 : vector<2x32xf32>
    %234 = arith.negf %233 : vector<2x32xf32>
    %235 = math.exp %234 : vector<2x32xf32>
    %cst_68 = arith.constant 1.000000e+00 : f32
    %236 = vector.broadcast %cst_68 : f32 to vector<2x32xf32>
    %237 = arith.addf %236, %235 : vector<2x32xf32>
    %238 = arith.divf %236, %237 : vector<2x32xf32>
    %239 = vector.extract_strided_slice %228 {offsets = [0, 32], sizes = [2, 32], strides = [1, 1]} : vector<2x96xf32> to vector<2x32xf32>
    %240 = vector.extract_strided_slice %230 {offsets = [0, 32], sizes = [2, 32], strides = [1, 1]} : vector<2x96xf32> to vector<2x32xf32>
    %241 = arith.addf %239, %240 : vector<2x32xf32>
    %242 = arith.negf %241 : vector<2x32xf32>
    %243 = math.exp %242 : vector<2x32xf32>
    %cst_69 = arith.constant 1.000000e+00 : f32
    %244 = vector.broadcast %cst_69 : f32 to vector<2x32xf32>
    %245 = arith.addf %244, %243 : vector<2x32xf32>
    %246 = arith.divf %244, %245 : vector<2x32xf32>
    %247 = vector.extract_strided_slice %228 {offsets = [0, 64], sizes = [2, 32], strides = [1, 1]} : vector<2x96xf32> to vector<2x32xf32>
    %248 = vector.extract_strided_slice %230 {offsets = [0, 64], sizes = [2, 32], strides = [1, 1]} : vector<2x96xf32> to vector<2x32xf32>
    %249 = vector.broadcast %33 : vector<1x32xf32> to vector<2x32xf32>
    %250 = arith.addf %248, %249 : vector<2x32xf32>
    %251 = arith.mulf %238, %250 : vector<2x32xf32>
    %252 = arith.addf %247, %251 : vector<2x32xf32>
    %253 = math.tanh %252 : vector<2x32xf32>
    %cst_70 = arith.constant 1.000000e+00 : f32
    %254 = vector.broadcast %cst_70 : f32 to vector<2x32xf32>
    %255 = arith.subf %254, %246 : vector<2x32xf32>
    %256 = arith.mulf %255, %253 : vector<2x32xf32>
    %257 = arith.mulf %246, %220 : vector<2x32xf32>
    %258 = arith.addf %256, %257 : vector<2x32xf32>
    %259 = arith.truncf %258 : vector<2x32xf32> to vector<2x32xbf16>
    %260 = arith.index_cast %c5_i32 : i32 to index
    %c0_71 = arith.constant 0 : index
    %c0_72 = arith.constant 0 : index
    %261 = vector.load %arg16[%260, %c0_71, %c0_72] : memref<8x2x32xbf16, #tpu.memory_space<vmem>>, vector<1x2x32xbf16>
    %262 = vector.shape_cast %261 : vector<1x2x32xbf16> to vector<2x32xbf16>
    %263 = vector.shape_cast %259 : vector<2x32xbf16> to vector<1x2x32xbf16>
    tpu.vector_store %arg16[%260, %c0_71, %c0_72], %263 {strides = array<i32>} : memref<8x2x32xbf16, #tpu.memory_space<vmem>>, vector<1x2x32xbf16>,
    %c6_i32 = arith.constant 6 : i32
    %264 = arith.index_cast %c6_i32 : i32 to index
    %c0_73 = arith.constant 0 : index
    %c0_74 = arith.constant 0 : index
    %265 = vector.load %arg15[%264, %c0_73, %c0_74] : memref<8x2x96xf32, #tpu.memory_space<vmem>>, vector<1x2x96xf32>
    %266 = vector.shape_cast %265 : vector<1x2x96xf32> to vector<2x96xf32>
    %267 = arith.truncf %258 : vector<2x32xf32> to vector<2x32xbf16>
    %cst_75 = arith.constant dense<0.000000e+00> : vector<2x96xf32>
    %268 = tpu.matmul %267, %32, %cst_75 {dimension_numbers = #tpu.dot_dimension_numbers<[1], [0], [0], [1], [0, 0, 1, 1], [], []>} : vector<2x32xbf16>, vector<32x96xbf16>, vector<2x96xf32> -> vector<2x96xf32>
    %269 = vector.extract_strided_slice %266 {offsets = [0, 0], sizes = [2, 32], strides = [1, 1]} : vector<2x96xf32> to vector<2x32xf32>
    %270 = vector.extract_strided_slice %268 {offsets = [0, 0], sizes = [2, 32], strides = [1, 1]} : vector<2x96xf32> to vector<2x32xf32>
    %271 = arith.addf %269, %270 : vector<2x32xf32>
    %272 = arith.negf %271 : vector<2x32xf32>
    %273 = math.exp %272 : vector<2x32xf32>
    %cst_76 = arith.constant 1.000000e+00 : f32
    %274 = vector.broadcast %cst_76 : f32 to vector<2x32xf32>
    %275 = arith.addf %274, %273 : vector<2x32xf32>
    %276 = arith.divf %274, %275 : vector<2x32xf32>
    %277 = vector.extract_strided_slice %266 {offsets = [0, 32], sizes = [2, 32], strides = [1, 1]} : vector<2x96xf32> to vector<2x32xf32>
    %278 = vector.extract_strided_slice %268 {offsets = [0, 32], sizes = [2, 32], strides = [1, 1]} : vector<2x96xf32> to vector<2x32xf32>
    %279 = arith.addf %277, %278 : vector<2x32xf32>
    %280 = arith.negf %279 : vector<2x32xf32>
    %281 = math.exp %280 : vector<2x32xf32>
    %cst_77 = arith.constant 1.000000e+00 : f32
    %282 = vector.broadcast %cst_77 : f32 to vector<2x32xf32>
    %283 = arith.addf %282, %281 : vector<2x32xf32>
    %284 = arith.divf %282, %283 : vector<2x32xf32>
    %285 = vector.extract_strided_slice %266 {offsets = [0, 64], sizes = [2, 32], strides = [1, 1]} : vector<2x96xf32> to vector<2x32xf32>
    %286 = vector.extract_strided_slice %268 {offsets = [0, 64], sizes = [2, 32], strides = [1, 1]} : vector<2x96xf32> to vector<2x32xf32>
    %287 = vector.broadcast %33 : vector<1x32xf32> to vector<2x32xf32>
    %288 = arith.addf %286, %287 : vector<2x32xf32>
    %289 = arith.mulf %276, %288 : vector<2x32xf32>
    %290 = arith.addf %285, %289 : vector<2x32xf32>
    %291 = math.tanh %290 : vector<2x32xf32>
    %cst_78 = arith.constant 1.000000e+00 : f32
    %292 = vector.broadcast %cst_78 : f32 to vector<2x32xf32>
    %293 = arith.subf %292, %284 : vector<2x32xf32>
    %294 = arith.mulf %293, %291 : vector<2x32xf32>
    %295 = arith.mulf %284, %258 : vector<2x32xf32>
    %296 = arith.addf %294, %295 : vector<2x32xf32>
    %297 = arith.truncf %296 : vector<2x32xf32> to vector<2x32xbf16>
    %298 = arith.index_cast %c6_i32 : i32 to index
    %c0_79 = arith.constant 0 : index
    %c0_80 = arith.constant 0 : index
    %299 = vector.load %arg16[%298, %c0_79, %c0_80] : memref<8x2x32xbf16, #tpu.memory_space<vmem>>, vector<1x2x32xbf16>
    %300 = vector.shape_cast %299 : vector<1x2x32xbf16> to vector<2x32xbf16>
    %301 = vector.shape_cast %297 : vector<2x32xbf16> to vector<1x2x32xbf16>
    tpu.vector_store %arg16[%298, %c0_79, %c0_80], %301 {strides = array<i32>} : memref<8x2x32xbf16, #tpu.memory_space<vmem>>, vector<1x2x32xbf16>,
    %c7_i32 = arith.constant 7 : i32
    %302 = arith.index_cast %c7_i32 : i32 to index
    %c0_81 = arith.constant 0 : index
    %c0_82 = arith.constant 0 : index
    %303 = vector.load %arg15[%302, %c0_81, %c0_82] : memref<8x2x96xf32, #tpu.memory_space<vmem>>, vector<1x2x96xf32>
    %304 = vector.shape_cast %303 : vector<1x2x96xf32> to vector<2x96xf32>
    %305 = arith.truncf %296 : vector<2x32xf32> to vector<2x32xbf16>
    %cst_83 = arith.constant dense<0.000000e+00> : vector<2x96xf32>
    %306 = tpu.matmul %305, %32, %cst_83 {dimension_numbers = #tpu.dot_dimension_numbers<[1], [0], [0], [1], [0, 0, 1, 1], [], []>} : vector<2x32xbf16>, vector<32x96xbf16>, vector<2x96xf32> -> vector<2x96xf32>
    %307 = vector.extract_strided_slice %304 {offsets = [0, 0], sizes = [2, 32], strides = [1, 1]} : vector<2x96xf32> to vector<2x32xf32>
    %308 = vector.extract_strided_slice %306 {offsets = [0, 0], sizes = [2, 32], strides = [1, 1]} : vector<2x96xf32> to vector<2x32xf32>
    %309 = arith.addf %307, %308 : vector<2x32xf32>
    %310 = arith.negf %309 : vector<2x32xf32>
    %311 = math.exp %310 : vector<2x32xf32>
    %cst_84 = arith.constant 1.000000e+00 : f32
    %312 = vector.broadcast %cst_84 : f32 to vector<2x32xf32>
    %313 = arith.addf %312, %311 : vector<2x32xf32>
    %314 = arith.divf %312, %313 : vector<2x32xf32>
    %315 = vector.extract_strided_slice %304 {offsets = [0, 32], sizes = [2, 32], strides = [1, 1]} : vector<2x96xf32> to vector<2x32xf32>
    %316 = vector.extract_strided_slice %306 {offsets = [0, 32], sizes = [2, 32], strides = [1, 1]} : vector<2x96xf32> to vector<2x32xf32>
    %317 = arith.addf %315, %316 : vector<2x32xf32>
    %318 = arith.negf %317 : vector<2x32xf32>
    %319 = math.exp %318 : vector<2x32xf32>
    %cst_85 = arith.constant 1.000000e+00 : f32
    %320 = vector.broadcast %cst_85 : f32 to vector<2x32xf32>
    %321 = arith.addf %320, %319 : vector<2x32xf32>
    %322 = arith.divf %320, %321 : vector<2x32xf32>
    %323 = vector.extract_strided_slice %304 {offsets = [0, 64], sizes = [2, 32], strides = [1, 1]} : vector<2x96xf32> to vector<2x32xf32>
    %324 = vector.extract_strided_slice %306 {offsets = [0, 64], sizes = [2, 32], strides = [1, 1]} : vector<2x96xf32> to vector<2x32xf32>
    %325 = vector.broadcast %33 : vector<1x32xf32> to vector<2x32xf32>
    %326 = arith.addf %324, %325 : vector<2x32xf32>
    %327 = arith.mulf %314, %326 : vector<2x32xf32>
    %328 = arith.addf %323, %327 : vector<2x32xf32>
    %329 = math.tanh %328 : vector<2x32xf32>
    %cst_86 = arith.constant 1.000000e+00 : f32
    %330 = vector.broadcast %cst_86 : f32 to vector<2x32xf32>
    %331 = arith.subf %330, %322 : vector<2x32xf32>
    %332 = arith.mulf %331, %329 : vector<2x32xf32>
    %333 = arith.mulf %322, %296 : vector<2x32xf32>
    %334 = arith.addf %332, %333 : vector<2x32xf32>
    %335 = arith.truncf %334 : vector<2x32xf32> to vector<2x32xbf16>
    %336 = arith.index_cast %c7_i32 : i32 to index
    %c0_87 = arith.constant 0 : index
    %c0_88 = arith.constant 0 : index
    %337 = vector.load %arg16[%336, %c0_87, %c0_88] : memref<8x2x32xbf16, #tpu.memory_space<vmem>>, vector<1x2x32xbf16>
    %338 = vector.shape_cast %337 : vector<1x2x32xbf16> to vector<2x32xbf16>
    %339 = vector.shape_cast %335 : vector<2x32xbf16> to vector<1x2x32xbf16>
    tpu.vector_store %arg16[%336, %c0_87, %c0_88], %339 {strides = array<i32>} : memref<8x2x32xbf16, #tpu.memory_space<vmem>>, vector<1x2x32xbf16>,
    %c8_i32 = arith.constant 8 : i32
    %c0_89 = arith.constant 0 : index
    %c0_90 = arith.constant 0 : index
    %c0_91 = arith.constant 0 : index
    %340 = vector.load %arg14[%c0_89, %c0_90, %c0_91] : memref<2x2x32xf32, #tpu.memory_space<vmem>>, vector<1x2x32xf32>
    %341 = vector.shape_cast %340 : vector<1x2x32xf32> to vector<2x32xf32>
    %342 = vector.shape_cast %334 : vector<2x32xf32> to vector<1x2x32xf32>
    tpu.vector_store %arg14[%c0_89, %c0_90, %c0_91], %342 {strides = array<i32>} : memref<2x2x32xf32, #tpu.memory_space<vmem>>, vector<1x2x32xf32>,
    %c0_92 = arith.constant 0 : index
    %c0_93 = arith.constant 0 : index
    %c0_94 = arith.constant 0 : index
    %343 = vector.load %arg16[%c0_92, %c0_93, %c0_94] : memref<8x2x32xbf16, #tpu.memory_space<vmem>>, vector<8x2x32xbf16>
    %344 = vector.shape_cast %343 : vector<8x2x32xbf16> to vector<16x32xbf16>
    %c0_95 = arith.constant 0 : index
    %c0_96 = arith.constant 0 : index
    %345 = vector.load %arg9[%c0_95, %c0_96] : memref<32x96xbf16, #tpu.memory_space<vmem>>, vector<32x96xbf16>
    %cst_97 = arith.constant dense<0.000000e+00> : vector<16x96xf32>
    %346 = tpu.matmul %344, %345, %cst_97 {dimension_numbers = #tpu.dot_dimension_numbers<[1], [0], [0], [1], [0, 0, 1, 1], [], []>} : vector<16x32xbf16>, vector<32x96xbf16>, vector<16x96xf32> -> vector<16x96xf32>
    %c0_98 = arith.constant 0 : index
    %c0_99 = arith.constant 0 : index
    %347 = vector.load %arg10[%c0_98, %c0_99] : memref<1x96xf32, #tpu.memory_space<vmem>>, vector<1x96xf32>
    %348 = vector.broadcast %347 : vector<1x96xf32> to vector<16x96xf32>
    %349 = arith.addf %346, %348 : vector<16x96xf32>
    %350 = vector.shape_cast %349 : vector<16x96xf32> to vector<8x2x96xf32>
    %c0_100 = arith.constant 0 : index
    %c0_101 = arith.constant 0 : index
    %c0_102 = arith.constant 0 : index
    %351 = vector.load %arg15[%c0_100, %c0_101, %c0_102] : memref<8x2x96xf32, #tpu.memory_space<vmem>>, vector<8x2x96xf32>
    tpu.vector_store %arg15[%c0_100, %c0_101, %c0_102], %350 {strides = array<i32>} : memref<8x2x96xf32, #tpu.memory_space<vmem>>, vector<8x2x96xf32>,
    %c0_103 = arith.constant 0 : index
    %c0_104 = arith.constant 0 : index
    %352 = vector.load %arg11[%c0_103, %c0_104] : memref<32x96xbf16, #tpu.memory_space<vmem>>, vector<32x96xbf16>
    %c0_105 = arith.constant 0 : index
    %c0_106 = arith.constant 0 : index
    %353 = vector.load %arg12[%c0_105, %c0_106] : memref<1x32xf32, #tpu.memory_space<vmem>>, vector<1x32xf32>
    %c1 = arith.constant 1 : index
    %c0_107 = arith.constant 0 : index
    %c0_108 = arith.constant 0 : index
    %354 = vector.load %arg4[%c1, %c0_107, %c0_108] : memref<2x2x32xf32, #tpu.memory_space<vmem>>, vector<1x2x32xf32>
    %355 = vector.shape_cast %354 : vector<1x2x32xf32> to vector<2x32xf32>
    %c0_i32_109 = arith.constant 0 : i32
    %356 = arith.index_cast %c0_i32_109 : i32 to index
    %c0_110 = arith.constant 0 : index
    %c0_111 = arith.constant 0 : index
    %357 = vector.load %arg15[%356, %c0_110, %c0_111] : memref<8x2x96xf32, #tpu.memory_space<vmem>>, vector<1x2x96xf32>
    %358 = vector.shape_cast %357 : vector<1x2x96xf32> to vector<2x96xf32>
    %359 = arith.truncf %355 : vector<2x32xf32> to vector<2x32xbf16>
    %cst_112 = arith.constant dense<0.000000e+00> : vector<2x96xf32>
    %360 = tpu.matmul %359, %352, %cst_112 {dimension_numbers = #tpu.dot_dimension_numbers<[1], [0], [0], [1], [0, 0, 1, 1], [], []>} : vector<2x32xbf16>, vector<32x96xbf16>, vector<2x96xf32> -> vector<2x96xf32>
    %361 = vector.extract_strided_slice %358 {offsets = [0, 0], sizes = [2, 32], strides = [1, 1]} : vector<2x96xf32> to vector<2x32xf32>
    %362 = vector.extract_strided_slice %360 {offsets = [0, 0], sizes = [2, 32], strides = [1, 1]} : vector<2x96xf32> to vector<2x32xf32>
    %363 = arith.addf %361, %362 : vector<2x32xf32>
    %364 = arith.negf %363 : vector<2x32xf32>
    %365 = math.exp %364 : vector<2x32xf32>
    %cst_113 = arith.constant 1.000000e+00 : f32
    %366 = vector.broadcast %cst_113 : f32 to vector<2x32xf32>
    %367 = arith.addf %366, %365 : vector<2x32xf32>
    %368 = arith.divf %366, %367 : vector<2x32xf32>
    %369 = vector.extract_strided_slice %358 {offsets = [0, 32], sizes = [2, 32], strides = [1, 1]} : vector<2x96xf32> to vector<2x32xf32>
    %370 = vector.extract_strided_slice %360 {offsets = [0, 32], sizes = [2, 32], strides = [1, 1]} : vector<2x96xf32> to vector<2x32xf32>
    %371 = arith.addf %369, %370 : vector<2x32xf32>
    %372 = arith.negf %371 : vector<2x32xf32>
    %373 = math.exp %372 : vector<2x32xf32>
    %cst_114 = arith.constant 1.000000e+00 : f32
    %374 = vector.broadcast %cst_114 : f32 to vector<2x32xf32>
    %375 = arith.addf %374, %373 : vector<2x32xf32>
    %376 = arith.divf %374, %375 : vector<2x32xf32>
    %377 = vector.extract_strided_slice %358 {offsets = [0, 64], sizes = [2, 32], strides = [1, 1]} : vector<2x96xf32> to vector<2x32xf32>
    %378 = vector.extract_strided_slice %360 {offsets = [0, 64], sizes = [2, 32], strides = [1, 1]} : vector<2x96xf32> to vector<2x32xf32>
    %379 = vector.broadcast %353 : vector<1x32xf32> to vector<2x32xf32>
    %380 = arith.addf %378, %379 : vector<2x32xf32>
    %381 = arith.mulf %368, %380 : vector<2x32xf32>
    %382 = arith.addf %377, %381 : vector<2x32xf32>
    %383 = math.tanh %382 : vector<2x32xf32>
    %cst_115 = arith.constant 1.000000e+00 : f32
    %384 = vector.broadcast %cst_115 : f32 to vector<2x32xf32>
    %385 = arith.subf %384, %376 : vector<2x32xf32>
    %386 = arith.mulf %385, %383 : vector<2x32xf32>
    %387 = arith.mulf %376, %355 : vector<2x32xf32>
    %388 = arith.addf %386, %387 : vector<2x32xf32>
    %389 = arith.index_cast %c0_i32_109 : i32 to index
    %c0_116 = arith.constant 0 : index
    %c0_117 = arith.constant 0 : index
    %390 = vector.load %arg13[%389, %c0_116, %c0_117] : memref<8x2x32xf32, #tpu.memory_space<vmem>>, vector<1x2x32xf32>
    %391 = vector.shape_cast %390 : vector<1x2x32xf32> to vector<2x32xf32>
    %392 = vector.shape_cast %388 : vector<2x32xf32> to vector<1x2x32xf32>
    tpu.vector_store %arg13[%389, %c0_116, %c0_117], %392 {strides = array<i32>} : memref<8x2x32xf32, #tpu.memory_space<vmem>>, vector<1x2x32xf32>,
    %c1_i32_118 = arith.constant 1 : i32
    %393 = arith.index_cast %c1_i32_118 : i32 to index
    %c0_119 = arith.constant 0 : index
    %c0_120 = arith.constant 0 : index
    %394 = vector.load %arg15[%393, %c0_119, %c0_120] : memref<8x2x96xf32, #tpu.memory_space<vmem>>, vector<1x2x96xf32>
    %395 = vector.shape_cast %394 : vector<1x2x96xf32> to vector<2x96xf32>
    %396 = arith.truncf %388 : vector<2x32xf32> to vector<2x32xbf16>
    %cst_121 = arith.constant dense<0.000000e+00> : vector<2x96xf32>
    %397 = tpu.matmul %396, %352, %cst_121 {dimension_numbers = #tpu.dot_dimension_numbers<[1], [0], [0], [1], [0, 0, 1, 1], [], []>} : vector<2x32xbf16>, vector<32x96xbf16>, vector<2x96xf32> -> vector<2x96xf32>
    %398 = vector.extract_strided_slice %395 {offsets = [0, 0], sizes = [2, 32], strides = [1, 1]} : vector<2x96xf32> to vector<2x32xf32>
    %399 = vector.extract_strided_slice %397 {offsets = [0, 0], sizes = [2, 32], strides = [1, 1]} : vector<2x96xf32> to vector<2x32xf32>
    %400 = arith.addf %398, %399 : vector<2x32xf32>
    %401 = arith.negf %400 : vector<2x32xf32>
    %402 = math.exp %401 : vector<2x32xf32>
    %cst_122 = arith.constant 1.000000e+00 : f32
    %403 = vector.broadcast %cst_122 : f32 to vector<2x32xf32>
    %404 = arith.addf %403, %402 : vector<2x32xf32>
    %405 = arith.divf %403, %404 : vector<2x32xf32>
    %406 = vector.extract_strided_slice %395 {offsets = [0, 32], sizes = [2, 32], strides = [1, 1]} : vector<2x96xf32> to vector<2x32xf32>
    %407 = vector.extract_strided_slice %397 {offsets = [0, 32], sizes = [2, 32], strides = [1, 1]} : vector<2x96xf32> to vector<2x32xf32>
    %408 = arith.addf %406, %407 : vector<2x32xf32>
    %409 = arith.negf %408 : vector<2x32xf32>
    %410 = math.exp %409 : vector<2x32xf32>
    %cst_123 = arith.constant 1.000000e+00 : f32
    %411 = vector.broadcast %cst_123 : f32 to vector<2x32xf32>
    %412 = arith.addf %411, %410 : vector<2x32xf32>
    %413 = arith.divf %411, %412 : vector<2x32xf32>
    %414 = vector.extract_strided_slice %395 {offsets = [0, 64], sizes = [2, 32], strides = [1, 1]} : vector<2x96xf32> to vector<2x32xf32>
    %415 = vector.extract_strided_slice %397 {offsets = [0, 64], sizes = [2, 32], strides = [1, 1]} : vector<2x96xf32> to vector<2x32xf32>
    %416 = vector.broadcast %353 : vector<1x32xf32> to vector<2x32xf32>
    %417 = arith.addf %415, %416 : vector<2x32xf32>
    %418 = arith.mulf %405, %417 : vector<2x32xf32>
    %419 = arith.addf %414, %418 : vector<2x32xf32>
    %420 = math.tanh %419 : vector<2x32xf32>
    %cst_124 = arith.constant 1.000000e+00 : f32
    %421 = vector.broadcast %cst_124 : f32 to vector<2x32xf32>
    %422 = arith.subf %421, %413 : vector<2x32xf32>
    %423 = arith.mulf %422, %420 : vector<2x32xf32>
    %424 = arith.mulf %413, %388 : vector<2x32xf32>
    %425 = arith.addf %423, %424 : vector<2x32xf32>
    %426 = arith.index_cast %c1_i32_118 : i32 to index
    %c0_125 = arith.constant 0 : index
    %c0_126 = arith.constant 0 : index
    %427 = vector.load %arg13[%426, %c0_125, %c0_126] : memref<8x2x32xf32, #tpu.memory_space<vmem>>, vector<1x2x32xf32>
    %428 = vector.shape_cast %427 : vector<1x2x32xf32> to vector<2x32xf32>
    %429 = vector.shape_cast %425 : vector<2x32xf32> to vector<1x2x32xf32>
    tpu.vector_store %arg13[%426, %c0_125, %c0_126], %429 {strides = array<i32>} : memref<8x2x32xf32, #tpu.memory_space<vmem>>, vector<1x2x32xf32>,
    %c2_i32_127 = arith.constant 2 : i32
    %430 = arith.index_cast %c2_i32_127 : i32 to index
    %c0_128 = arith.constant 0 : index
    %c0_129 = arith.constant 0 : index
    %431 = vector.load %arg15[%430, %c0_128, %c0_129] : memref<8x2x96xf32, #tpu.memory_space<vmem>>, vector<1x2x96xf32>
    %432 = vector.shape_cast %431 : vector<1x2x96xf32> to vector<2x96xf32>
    %433 = arith.truncf %425 : vector<2x32xf32> to vector<2x32xbf16>
    %cst_130 = arith.constant dense<0.000000e+00> : vector<2x96xf32>
    %434 = tpu.matmul %433, %352, %cst_130 {dimension_numbers = #tpu.dot_dimension_numbers<[1], [0], [0], [1], [0, 0, 1, 1], [], []>} : vector<2x32xbf16>, vector<32x96xbf16>, vector<2x96xf32> -> vector<2x96xf32>
    %435 = vector.extract_strided_slice %432 {offsets = [0, 0], sizes = [2, 32], strides = [1, 1]} : vector<2x96xf32> to vector<2x32xf32>
    %436 = vector.extract_strided_slice %434 {offsets = [0, 0], sizes = [2, 32], strides = [1, 1]} : vector<2x96xf32> to vector<2x32xf32>
    %437 = arith.addf %435, %436 : vector<2x32xf32>
    %438 = arith.negf %437 : vector<2x32xf32>
    %439 = math.exp %438 : vector<2x32xf32>
    %cst_131 = arith.constant 1.000000e+00 : f32
    %440 = vector.broadcast %cst_131 : f32 to vector<2x32xf32>
    %441 = arith.addf %440, %439 : vector<2x32xf32>
    %442 = arith.divf %440, %441 : vector<2x32xf32>
    %443 = vector.extract_strided_slice %432 {offsets = [0, 32], sizes = [2, 32], strides = [1, 1]} : vector<2x96xf32> to vector<2x32xf32>
    %444 = vector.extract_strided_slice %434 {offsets = [0, 32], sizes = [2, 32], strides = [1, 1]} : vector<2x96xf32> to vector<2x32xf32>
    %445 = arith.addf %443, %444 : vector<2x32xf32>
    %446 = arith.negf %445 : vector<2x32xf32>
    %447 = math.exp %446 : vector<2x32xf32>
    %cst_132 = arith.constant 1.000000e+00 : f32
    %448 = vector.broadcast %cst_132 : f32 to vector<2x32xf32>
    %449 = arith.addf %448, %447 : vector<2x32xf32>
    %450 = arith.divf %448, %449 : vector<2x32xf32>
    %451 = vector.extract_strided_slice %432 {offsets = [0, 64], sizes = [2, 32], strides = [1, 1]} : vector<2x96xf32> to vector<2x32xf32>
    %452 = vector.extract_strided_slice %434 {offsets = [0, 64], sizes = [2, 32], strides = [1, 1]} : vector<2x96xf32> to vector<2x32xf32>
    %453 = vector.broadcast %353 : vector<1x32xf32> to vector<2x32xf32>
    %454 = arith.addf %452, %453 : vector<2x32xf32>
    %455 = arith.mulf %442, %454 : vector<2x32xf32>
    %456 = arith.addf %451, %455 : vector<2x32xf32>
    %457 = math.tanh %456 : vector<2x32xf32>
    %cst_133 = arith.constant 1.000000e+00 : f32
    %458 = vector.broadcast %cst_133 : f32 to vector<2x32xf32>
    %459 = arith.subf %458, %450 : vector<2x32xf32>
    %460 = arith.mulf %459, %457 : vector<2x32xf32>
    %461 = arith.mulf %450, %425 : vector<2x32xf32>
    %462 = arith.addf %460, %461 : vector<2x32xf32>
    %463 = arith.index_cast %c2_i32_127 : i32 to index
    %c0_134 = arith.constant 0 : index
    %c0_135 = arith.constant 0 : index
    %464 = vector.load %arg13[%463, %c0_134, %c0_135] : memref<8x2x32xf32, #tpu.memory_space<vmem>>, vector<1x2x32xf32>
    %465 = vector.shape_cast %464 : vector<1x2x32xf32> to vector<2x32xf32>
    %466 = vector.shape_cast %462 : vector<2x32xf32> to vector<1x2x32xf32>
    tpu.vector_store %arg13[%463, %c0_134, %c0_135], %466 {strides = array<i32>} : memref<8x2x32xf32, #tpu.memory_space<vmem>>, vector<1x2x32xf32>,
    %c3_i32_136 = arith.constant 3 : i32
    %467 = arith.index_cast %c3_i32_136 : i32 to index
    %c0_137 = arith.constant 0 : index
    %c0_138 = arith.constant 0 : index
    %468 = vector.load %arg15[%467, %c0_137, %c0_138] : memref<8x2x96xf32, #tpu.memory_space<vmem>>, vector<1x2x96xf32>
    %469 = vector.shape_cast %468 : vector<1x2x96xf32> to vector<2x96xf32>
    %470 = arith.truncf %462 : vector<2x32xf32> to vector<2x32xbf16>
    %cst_139 = arith.constant dense<0.000000e+00> : vector<2x96xf32>
    %471 = tpu.matmul %470, %352, %cst_139 {dimension_numbers = #tpu.dot_dimension_numbers<[1], [0], [0], [1], [0, 0, 1, 1], [], []>} : vector<2x32xbf16>, vector<32x96xbf16>, vector<2x96xf32> -> vector<2x96xf32>
    %472 = vector.extract_strided_slice %469 {offsets = [0, 0], sizes = [2, 32], strides = [1, 1]} : vector<2x96xf32> to vector<2x32xf32>
    %473 = vector.extract_strided_slice %471 {offsets = [0, 0], sizes = [2, 32], strides = [1, 1]} : vector<2x96xf32> to vector<2x32xf32>
    %474 = arith.addf %472, %473 : vector<2x32xf32>
    %475 = arith.negf %474 : vector<2x32xf32>
    %476 = math.exp %475 : vector<2x32xf32>
    %cst_140 = arith.constant 1.000000e+00 : f32
    %477 = vector.broadcast %cst_140 : f32 to vector<2x32xf32>
    %478 = arith.addf %477, %476 : vector<2x32xf32>
    %479 = arith.divf %477, %478 : vector<2x32xf32>
    %480 = vector.extract_strided_slice %469 {offsets = [0, 32], sizes = [2, 32], strides = [1, 1]} : vector<2x96xf32> to vector<2x32xf32>
    %481 = vector.extract_strided_slice %471 {offsets = [0, 32], sizes = [2, 32], strides = [1, 1]} : vector<2x96xf32> to vector<2x32xf32>
    %482 = arith.addf %480, %481 : vector<2x32xf32>
    %483 = arith.negf %482 : vector<2x32xf32>
    %484 = math.exp %483 : vector<2x32xf32>
    %cst_141 = arith.constant 1.000000e+00 : f32
    %485 = vector.broadcast %cst_141 : f32 to vector<2x32xf32>
    %486 = arith.addf %485, %484 : vector<2x32xf32>
    %487 = arith.divf %485, %486 : vector<2x32xf32>
    %488 = vector.extract_strided_slice %469 {offsets = [0, 64], sizes = [2, 32], strides = [1, 1]} : vector<2x96xf32> to vector<2x32xf32>
    %489 = vector.extract_strided_slice %471 {offsets = [0, 64], sizes = [2, 32], strides = [1, 1]} : vector<2x96xf32> to vector<2x32xf32>
    %490 = vector.broadcast %353 : vector<1x32xf32> to vector<2x32xf32>
    %491 = arith.addf %489, %490 : vector<2x32xf32>
    %492 = arith.mulf %479, %491 : vector<2x32xf32>
    %493 = arith.addf %488, %492 : vector<2x32xf32>
    %494 = math.tanh %493 : vector<2x32xf32>
    %cst_142 = arith.constant 1.000000e+00 : f32
    %495 = vector.broadcast %cst_142 : f32 to vector<2x32xf32>
    %496 = arith.subf %495, %487 : vector<2x32xf32>
    %497 = arith.mulf %496, %494 : vector<2x32xf32>
    %498 = arith.mulf %487, %462 : vector<2x32xf32>
    %499 = arith.addf %497, %498 : vector<2x32xf32>
    %500 = arith.index_cast %c3_i32_136 : i32 to index
    %c0_143 = arith.constant 0 : index
    %c0_144 = arith.constant 0 : index
    %501 = vector.load %arg13[%500, %c0_143, %c0_144] : memref<8x2x32xf32, #tpu.memory_space<vmem>>, vector<1x2x32xf32>
    %502 = vector.shape_cast %501 : vector<1x2x32xf32> to vector<2x32xf32>
    %503 = vector.shape_cast %499 : vector<2x32xf32> to vector<1x2x32xf32>
    tpu.vector_store %arg13[%500, %c0_143, %c0_144], %503 {strides = array<i32>} : memref<8x2x32xf32, #tpu.memory_space<vmem>>, vector<1x2x32xf32>,
    %c4_i32_145 = arith.constant 4 : i32
    %504 = arith.index_cast %c4_i32_145 : i32 to index
    %c0_146 = arith.constant 0 : index
    %c0_147 = arith.constant 0 : index
    %505 = vector.load %arg15[%504, %c0_146, %c0_147] : memref<8x2x96xf32, #tpu.memory_space<vmem>>, vector<1x2x96xf32>
    %506 = vector.shape_cast %505 : vector<1x2x96xf32> to vector<2x96xf32>
    %507 = arith.truncf %499 : vector<2x32xf32> to vector<2x32xbf16>
    %cst_148 = arith.constant dense<0.000000e+00> : vector<2x96xf32>
    %508 = tpu.matmul %507, %352, %cst_148 {dimension_numbers = #tpu.dot_dimension_numbers<[1], [0], [0], [1], [0, 0, 1, 1], [], []>} : vector<2x32xbf16>, vector<32x96xbf16>, vector<2x96xf32> -> vector<2x96xf32>
    %509 = vector.extract_strided_slice %506 {offsets = [0, 0], sizes = [2, 32], strides = [1, 1]} : vector<2x96xf32> to vector<2x32xf32>
    %510 = vector.extract_strided_slice %508 {offsets = [0, 0], sizes = [2, 32], strides = [1, 1]} : vector<2x96xf32> to vector<2x32xf32>
    %511 = arith.addf %509, %510 : vector<2x32xf32>
    %512 = arith.negf %511 : vector<2x32xf32>
    %513 = math.exp %512 : vector<2x32xf32>
    %cst_149 = arith.constant 1.000000e+00 : f32
    %514 = vector.broadcast %cst_149 : f32 to vector<2x32xf32>
    %515 = arith.addf %514, %513 : vector<2x32xf32>
    %516 = arith.divf %514, %515 : vector<2x32xf32>
    %517 = vector.extract_strided_slice %506 {offsets = [0, 32], sizes = [2, 32], strides = [1, 1]} : vector<2x96xf32> to vector<2x32xf32>
    %518 = vector.extract_strided_slice %508 {offsets = [0, 32], sizes = [2, 32], strides = [1, 1]} : vector<2x96xf32> to vector<2x32xf32>
    %519 = arith.addf %517, %518 : vector<2x32xf32>
    %520 = arith.negf %519 : vector<2x32xf32>
    %521 = math.exp %520 : vector<2x32xf32>
    %cst_150 = arith.constant 1.000000e+00 : f32
    %522 = vector.broadcast %cst_150 : f32 to vector<2x32xf32>
    %523 = arith.addf %522, %521 : vector<2x32xf32>
    %524 = arith.divf %522, %523 : vector<2x32xf32>
    %525 = vector.extract_strided_slice %506 {offsets = [0, 64], sizes = [2, 32], strides = [1, 1]} : vector<2x96xf32> to vector<2x32xf32>
    %526 = vector.extract_strided_slice %508 {offsets = [0, 64], sizes = [2, 32], strides = [1, 1]} : vector<2x96xf32> to vector<2x32xf32>
    %527 = vector.broadcast %353 : vector<1x32xf32> to vector<2x32xf32>
    %528 = arith.addf %526, %527 : vector<2x32xf32>
    %529 = arith.mulf %516, %528 : vector<2x32xf32>
    %530 = arith.addf %525, %529 : vector<2x32xf32>
    %531 = math.tanh %530 : vector<2x32xf32>
    %cst_151 = arith.constant 1.000000e+00 : f32
    %532 = vector.broadcast %cst_151 : f32 to vector<2x32xf32>
    %533 = arith.subf %532, %524 : vector<2x32xf32>
    %534 = arith.mulf %533, %531 : vector<2x32xf32>
    %535 = arith.mulf %524, %499 : vector<2x32xf32>
    %536 = arith.addf %534, %535 : vector<2x32xf32>
    %537 = arith.index_cast %c4_i32_145 : i32 to index
    %c0_152 = arith.constant 0 : index
    %c0_153 = arith.constant 0 : index
    %538 = vector.load %arg13[%537, %c0_152, %c0_153] : memref<8x2x32xf32, #tpu.memory_space<vmem>>, vector<1x2x32xf32>
    %539 = vector.shape_cast %538 : vector<1x2x32xf32> to vector<2x32xf32>
    %540 = vector.shape_cast %536 : vector<2x32xf32> to vector<1x2x32xf32>
    tpu.vector_store %arg13[%537, %c0_152, %c0_153], %540 {strides = array<i32>} : memref<8x2x32xf32, #tpu.memory_space<vmem>>, vector<1x2x32xf32>,
    %c5_i32_154 = arith.constant 5 : i32
    %541 = arith.index_cast %c5_i32_154 : i32 to index
    %c0_155 = arith.constant 0 : index
    %c0_156 = arith.constant 0 : index
    %542 = vector.load %arg15[%541, %c0_155, %c0_156] : memref<8x2x96xf32, #tpu.memory_space<vmem>>, vector<1x2x96xf32>
    %543 = vector.shape_cast %542 : vector<1x2x96xf32> to vector<2x96xf32>
    %544 = arith.truncf %536 : vector<2x32xf32> to vector<2x32xbf16>
    %cst_157 = arith.constant dense<0.000000e+00> : vector<2x96xf32>
    %545 = tpu.matmul %544, %352, %cst_157 {dimension_numbers = #tpu.dot_dimension_numbers<[1], [0], [0], [1], [0, 0, 1, 1], [], []>} : vector<2x32xbf16>, vector<32x96xbf16>, vector<2x96xf32> -> vector<2x96xf32>
    %546 = vector.extract_strided_slice %543 {offsets = [0, 0], sizes = [2, 32], strides = [1, 1]} : vector<2x96xf32> to vector<2x32xf32>
    %547 = vector.extract_strided_slice %545 {offsets = [0, 0], sizes = [2, 32], strides = [1, 1]} : vector<2x96xf32> to vector<2x32xf32>
    %548 = arith.addf %546, %547 : vector<2x32xf32>
    %549 = arith.negf %548 : vector<2x32xf32>
    %550 = math.exp %549 : vector<2x32xf32>
    %cst_158 = arith.constant 1.000000e+00 : f32
    %551 = vector.broadcast %cst_158 : f32 to vector<2x32xf32>
    %552 = arith.addf %551, %550 : vector<2x32xf32>
    %553 = arith.divf %551, %552 : vector<2x32xf32>
    %554 = vector.extract_strided_slice %543 {offsets = [0, 32], sizes = [2, 32], strides = [1, 1]} : vector<2x96xf32> to vector<2x32xf32>
    %555 = vector.extract_strided_slice %545 {offsets = [0, 32], sizes = [2, 32], strides = [1, 1]} : vector<2x96xf32> to vector<2x32xf32>
    %556 = arith.addf %554, %555 : vector<2x32xf32>
    %557 = arith.negf %556 : vector<2x32xf32>
    %558 = math.exp %557 : vector<2x32xf32>
    %cst_159 = arith.constant 1.000000e+00 : f32
    %559 = vector.broadcast %cst_159 : f32 to vector<2x32xf32>
    %560 = arith.addf %559, %558 : vector<2x32xf32>
    %561 = arith.divf %559, %560 : vector<2x32xf32>
    %562 = vector.extract_strided_slice %543 {offsets = [0, 64], sizes = [2, 32], strides = [1, 1]} : vector<2x96xf32> to vector<2x32xf32>
    %563 = vector.extract_strided_slice %545 {offsets = [0, 64], sizes = [2, 32], strides = [1, 1]} : vector<2x96xf32> to vector<2x32xf32>
    %564 = vector.broadcast %353 : vector<1x32xf32> to vector<2x32xf32>
    %565 = arith.addf %563, %564 : vector<2x32xf32>
    %566 = arith.mulf %553, %565 : vector<2x32xf32>
    %567 = arith.addf %562, %566 : vector<2x32xf32>
    %568 = math.tanh %567 : vector<2x32xf32>
    %cst_160 = arith.constant 1.000000e+00 : f32
    %569 = vector.broadcast %cst_160 : f32 to vector<2x32xf32>
    %570 = arith.subf %569, %561 : vector<2x32xf32>
    %571 = arith.mulf %570, %568 : vector<2x32xf32>
    %572 = arith.mulf %561, %536 : vector<2x32xf32>
    %573 = arith.addf %571, %572 : vector<2x32xf32>
    %574 = arith.index_cast %c5_i32_154 : i32 to index
    %c0_161 = arith.constant 0 : index
    %c0_162 = arith.constant 0 : index
    %575 = vector.load %arg13[%574, %c0_161, %c0_162] : memref<8x2x32xf32, #tpu.memory_space<vmem>>, vector<1x2x32xf32>
    %576 = vector.shape_cast %575 : vector<1x2x32xf32> to vector<2x32xf32>
    %577 = vector.shape_cast %573 : vector<2x32xf32> to vector<1x2x32xf32>
    tpu.vector_store %arg13[%574, %c0_161, %c0_162], %577 {strides = array<i32>} : memref<8x2x32xf32, #tpu.memory_space<vmem>>, vector<1x2x32xf32>,
    %c6_i32_163 = arith.constant 6 : i32
    %578 = arith.index_cast %c6_i32_163 : i32 to index
    %c0_164 = arith.constant 0 : index
    %c0_165 = arith.constant 0 : index
    %579 = vector.load %arg15[%578, %c0_164, %c0_165] : memref<8x2x96xf32, #tpu.memory_space<vmem>>, vector<1x2x96xf32>
    %580 = vector.shape_cast %579 : vector<1x2x96xf32> to vector<2x96xf32>
    %581 = arith.truncf %573 : vector<2x32xf32> to vector<2x32xbf16>
    %cst_166 = arith.constant dense<0.000000e+00> : vector<2x96xf32>
    %582 = tpu.matmul %581, %352, %cst_166 {dimension_numbers = #tpu.dot_dimension_numbers<[1], [0], [0], [1], [0, 0, 1, 1], [], []>} : vector<2x32xbf16>, vector<32x96xbf16>, vector<2x96xf32> -> vector<2x96xf32>
    %583 = vector.extract_strided_slice %580 {offsets = [0, 0], sizes = [2, 32], strides = [1, 1]} : vector<2x96xf32> to vector<2x32xf32>
    %584 = vector.extract_strided_slice %582 {offsets = [0, 0], sizes = [2, 32], strides = [1, 1]} : vector<2x96xf32> to vector<2x32xf32>
    %585 = arith.addf %583, %584 : vector<2x32xf32>
    %586 = arith.negf %585 : vector<2x32xf32>
    %587 = math.exp %586 : vector<2x32xf32>
    %cst_167 = arith.constant 1.000000e+00 : f32
    %588 = vector.broadcast %cst_167 : f32 to vector<2x32xf32>
    %589 = arith.addf %588, %587 : vector<2x32xf32>
    %590 = arith.divf %588, %589 : vector<2x32xf32>
    %591 = vector.extract_strided_slice %580 {offsets = [0, 32], sizes = [2, 32], strides = [1, 1]} : vector<2x96xf32> to vector<2x32xf32>
    %592 = vector.extract_strided_slice %582 {offsets = [0, 32], sizes = [2, 32], strides = [1, 1]} : vector<2x96xf32> to vector<2x32xf32>
    %593 = arith.addf %591, %592 : vector<2x32xf32>
    %594 = arith.negf %593 : vector<2x32xf32>
    %595 = math.exp %594 : vector<2x32xf32>
    %cst_168 = arith.constant 1.000000e+00 : f32
    %596 = vector.broadcast %cst_168 : f32 to vector<2x32xf32>
    %597 = arith.addf %596, %595 : vector<2x32xf32>
    %598 = arith.divf %596, %597 : vector<2x32xf32>
    %599 = vector.extract_strided_slice %580 {offsets = [0, 64], sizes = [2, 32], strides = [1, 1]} : vector<2x96xf32> to vector<2x32xf32>
    %600 = vector.extract_strided_slice %582 {offsets = [0, 64], sizes = [2, 32], strides = [1, 1]} : vector<2x96xf32> to vector<2x32xf32>
    %601 = vector.broadcast %353 : vector<1x32xf32> to vector<2x32xf32>
    %602 = arith.addf %600, %601 : vector<2x32xf32>
    %603 = arith.mulf %590, %602 : vector<2x32xf32>
    %604 = arith.addf %599, %603 : vector<2x32xf32>
    %605 = math.tanh %604 : vector<2x32xf32>
    %cst_169 = arith.constant 1.000000e+00 : f32
    %606 = vector.broadcast %cst_169 : f32 to vector<2x32xf32>
    %607 = arith.subf %606, %598 : vector<2x32xf32>
    %608 = arith.mulf %607, %605 : vector<2x32xf32>
    %609 = arith.mulf %598, %573 : vector<2x32xf32>
    %610 = arith.addf %608, %609 : vector<2x32xf32>
    %611 = arith.index_cast %c6_i32_163 : i32 to index
    %c0_170 = arith.constant 0 : index
    %c0_171 = arith.constant 0 : index
    %612 = vector.load %arg13[%611, %c0_170, %c0_171] : memref<8x2x32xf32, #tpu.memory_space<vmem>>, vector<1x2x32xf32>
    %613 = vector.shape_cast %612 : vector<1x2x32xf32> to vector<2x32xf32>
    %614 = vector.shape_cast %610 : vector<2x32xf32> to vector<1x2x32xf32>
    tpu.vector_store %arg13[%611, %c0_170, %c0_171], %614 {strides = array<i32>} : memref<8x2x32xf32, #tpu.memory_space<vmem>>, vector<1x2x32xf32>,
    %c7_i32_172 = arith.constant 7 : i32
    %615 = arith.index_cast %c7_i32_172 : i32 to index
    %c0_173 = arith.constant 0 : index
    %c0_174 = arith.constant 0 : index
    %616 = vector.load %arg15[%615, %c0_173, %c0_174] : memref<8x2x96xf32, #tpu.memory_space<vmem>>, vector<1x2x96xf32>
    %617 = vector.shape_cast %616 : vector<1x2x96xf32> to vector<2x96xf32>
    %618 = arith.truncf %610 : vector<2x32xf32> to vector<2x32xbf16>
    %cst_175 = arith.constant dense<0.000000e+00> : vector<2x96xf32>
    %619 = tpu.matmul %618, %352, %cst_175 {dimension_numbers = #tpu.dot_dimension_numbers<[1], [0], [0], [1], [0, 0, 1, 1], [], []>} : vector<2x32xbf16>, vector<32x96xbf16>, vector<2x96xf32> -> vector<2x96xf32>
    %620 = vector.extract_strided_slice %617 {offsets = [0, 0], sizes = [2, 32], strides = [1, 1]} : vector<2x96xf32> to vector<2x32xf32>
    %621 = vector.extract_strided_slice %619 {offsets = [0, 0], sizes = [2, 32], strides = [1, 1]} : vector<2x96xf32> to vector<2x32xf32>
    %622 = arith.addf %620, %621 : vector<2x32xf32>
    %623 = arith.negf %622 : vector<2x32xf32>
    %624 = math.exp %623 : vector<2x32xf32>
    %cst_176 = arith.constant 1.000000e+00 : f32
    %625 = vector.broadcast %cst_176 : f32 to vector<2x32xf32>
    %626 = arith.addf %625, %624 : vector<2x32xf32>
    %627 = arith.divf %625, %626 : vector<2x32xf32>
    %628 = vector.extract_strided_slice %617 {offsets = [0, 32], sizes = [2, 32], strides = [1, 1]} : vector<2x96xf32> to vector<2x32xf32>
    %629 = vector.extract_strided_slice %619 {offsets = [0, 32], sizes = [2, 32], strides = [1, 1]} : vector<2x96xf32> to vector<2x32xf32>
    %630 = arith.addf %628, %629 : vector<2x32xf32>
    %631 = arith.negf %630 : vector<2x32xf32>
    %632 = math.exp %631 : vector<2x32xf32>
    %cst_177 = arith.constant 1.000000e+00 : f32
    %633 = vector.broadcast %cst_177 : f32 to vector<2x32xf32>
    %634 = arith.addf %633, %632 : vector<2x32xf32>
    %635 = arith.divf %633, %634 : vector<2x32xf32>
    %636 = vector.extract_strided_slice %617 {offsets = [0, 64], sizes = [2, 32], strides = [1, 1]} : vector<2x96xf32> to vector<2x32xf32>
    %637 = vector.extract_strided_slice %619 {offsets = [0, 64], sizes = [2, 32], strides = [1, 1]} : vector<2x96xf32> to vector<2x32xf32>
    %638 = vector.broadcast %353 : vector<1x32xf32> to vector<2x32xf32>
    %639 = arith.addf %637, %638 : vector<2x32xf32>
    %640 = arith.mulf %627, %639 : vector<2x32xf32>
    %641 = arith.addf %636, %640 : vector<2x32xf32>
    %642 = math.tanh %641 : vector<2x32xf32>
    %cst_178 = arith.constant 1.000000e+00 : f32
    %643 = vector.broadcast %cst_178 : f32 to vector<2x32xf32>
    %644 = arith.subf %643, %635 : vector<2x32xf32>
    %645 = arith.mulf %644, %642 : vector<2x32xf32>
    %646 = arith.mulf %635, %610 : vector<2x32xf32>
    %647 = arith.addf %645, %646 : vector<2x32xf32>
    %648 = arith.index_cast %c7_i32_172 : i32 to index
    %c0_179 = arith.constant 0 : index
    %c0_180 = arith.constant 0 : index
    %649 = vector.load %arg13[%648, %c0_179, %c0_180] : memref<8x2x32xf32, #tpu.memory_space<vmem>>, vector<1x2x32xf32>
    %650 = vector.shape_cast %649 : vector<1x2x32xf32> to vector<2x32xf32>
    %651 = vector.shape_cast %647 : vector<2x32xf32> to vector<1x2x32xf32>
    tpu.vector_store %arg13[%648, %c0_179, %c0_180], %651 {strides = array<i32>} : memref<8x2x32xf32, #tpu.memory_space<vmem>>, vector<1x2x32xf32>,
    %c8_i32_181 = arith.constant 8 : i32
    %c1_182 = arith.constant 1 : index
    %c0_183 = arith.constant 0 : index
    %c0_184 = arith.constant 0 : index
    %652 = vector.load %arg14[%c1_182, %c0_183, %c0_184] : memref<2x2x32xf32, #tpu.memory_space<vmem>>, vector<1x2x32xf32>
    %653 = vector.shape_cast %652 : vector<1x2x32xf32> to vector<2x32xf32>
    %654 = vector.shape_cast %647 : vector<2x32xf32> to vector<1x2x32xf32>
    tpu.vector_store %arg14[%c1_182, %c0_183, %c0_184], %654 {strides = array<i32>} : memref<2x2x32xf32, #tpu.memory_space<vmem>>, vector<1x2x32xf32>,
    return
  }
  func.func @transform_0(%arg0: i32) -> (i32, i32, i32) {
    %c0_i32 = arith.constant 0 : i32
    %c0_i32_0 = arith.constant 0 : i32
    %c0_i32_1 = arith.constant 0 : i32
    return %c0_i32, %arg0, %c0_i32_0 : i32, i32, i32
  }
  func.func @transform_1(%arg0: i32) -> (i32, i32) {
    %c0_i32 = arith.constant 0 : i32
    %c0_i32_0 = arith.constant 0 : i32
    %c0_i32_1 = arith.constant 0 : i32
    return %c0_i32, %c0_i32_0 : i32, i32
  }
  func.func @transform_2(%arg0: i32) -> (i32, i32) {
    %c0_i32 = arith.constant 0 : i32
    %c0_i32_0 = arith.constant 0 : i32
    %c0_i32_1 = arith.constant 0 : i32
    return %c0_i32, %c0_i32_0 : i32, i32
  }
  func.func @transform_3(%arg0: i32) -> (i32, i32, i32) {
    %c0_i32 = arith.constant 0 : i32
    %c0_i32_0 = arith.constant 0 : i32
    %c0_i32_1 = arith.constant 0 : i32
    return %c0_i32, %arg0, %c0_i32_0 : i32, i32, i32
  }
  func.func @transform_4(%arg0: i32) -> (i32, i32) {
    %c0_i32 = arith.constant 0 : i32
    %c0_i32_0 = arith.constant 0 : i32
    %c0_i32_1 = arith.constant 0 : i32
    return %c0_i32, %c0_i32_0 : i32, i32
  }
  func.func @transform_5(%arg0: i32) -> (i32, i32) {
    %c0_i32 = arith.constant 0 : i32
    %c0_i32_0 = arith.constant 0 : i32
    %c0_i32_1 = arith.constant 0 : i32
    return %c0_i32, %c0_i32_0 : i32, i32
  }
  func.func @transform_6(%arg0: i32) -> (i32, i32) {
    %c0_i32 = arith.constant 0 : i32
    %c0_i32_0 = arith.constant 0 : i32
    %c0_i32_1 = arith.constant 0 : i32
    return %c0_i32, %c0_i32_0 : i32, i32
  }
  func.func @transform_7(%arg0: i32) -> (i32, i32) {
    %c0_i32 = arith.constant 0 : i32
    %c0_i32_0 = arith.constant 0 : i32
    %c0_i32_1 = arith.constant 0 : i32
    return %c0_i32, %c0_i32_0 : i32, i32
  }
  func.func @transform_8(%arg0: i32) -> (i32, i32) {
    %c0_i32 = arith.constant 0 : i32
    %c0_i32_0 = arith.constant 0 : i32
    %c0_i32_1 = arith.constant 0 : i32
    return %c0_i32, %c0_i32_0 : i32, i32
  }
  func.func @transform_9(%arg0: i32) -> (i32, i32) {
    %c0_i32 = arith.constant 0 : i32
    %c0_i32_0 = arith.constant 0 : i32
    %c0_i32_1 = arith.constant 0 : i32
    return %c0_i32, %c0_i32_0 : i32, i32
  }
  func.func @transform_10(%arg0: i32) -> (i32, i32) {
    %c0_i32 = arith.constant 0 : i32
    %c0_i32_0 = arith.constant 0 : i32
    %c0_i32_1 = arith.constant 0 : i32
    return %c0_i32, %c0_i32_0 : i32, i32
  }
  func.func @transform_11(%arg0: i32) -> (i32, i32) {
    %c0_i32 = arith.constant 0 : i32
    %c0_i32_0 = arith.constant 0 : i32
    %c0_i32_1 = arith.constant 0 : i32
    return %c0_i32, %c0_i32_0 : i32, i32
  }
  func.func @transform_12(%arg0: i32) -> (i32, i32, i32) {
    %c0_i32 = arith.constant 0 : i32
    %c0_i32_0 = arith.constant 0 : i32
    %c0_i32_1 = arith.constant 0 : i32
    return %c0_i32, %arg0, %c0_i32_0 : i32, i32, i32
  }
  func.func @transform_13(%arg0: i32) -> (i32, i32, i32) {
    %c0_i32 = arith.constant 0 : i32
    %c0_i32_0 = arith.constant 0 : i32
    %c0_i32_1 = arith.constant 0 : i32
    return %c0_i32, %arg0, %c0_i32_0 : i32, i32, i32
  }
}

</mosaic_0001>

<bundles_post_ra>
// kernel: grudet_forward.1
= control target key start
LH: loop header
LB: loop body
LE: loop exit
PB: predicated region body
PF: predicated region fallthrough
CT: control target
= control target key end

     0   :  { %v66_v2 = vlaneseq  ;;  %v2642_v5 = vmov 1983009808   ;;  %vm97_vm0 = vcmask 326656   ;;  %s3348_s0 = inlined_call_operand.vmem [shape: f32[8,2,40], index: 0, kind: input, shape index: {}]   ;;  %s3349_s1 = inlined_call_operand.vmem [shape: f32[1,40], index: 1, kind: input, shape index: {}]   ;;  %s3350_s2 = inlined_call_operand.vmem [shape: f32[1,40], index: 2, kind: input, shape index: {}]   ;;  %s3351_s3 = inlined_call_operand.vmem [shape: f32[2,2,32], index: 3, kind: input, shape index: {}]   ;;  %s3352_s4 = inlined_call_operand.vmem [shape: bf16[40,96], index: 4, kind: input, shape index: {}]   ;;  %s3353_s5 = inlined_call_operand.vmem [shape: f32[1,96], index: 5, kind: input, shape index: {}]   ;;  %s3354_s6 = inlined_call_operand.vmem [shape: bf16[32,96], index: 6, kind: input, shape index: {}]   ;;  %s3355_s7 = inlined_call_operand.vmem [shape: f32[1,32], index: 7, kind: input, shape index: {}]   ;;  %s3356_s8 = inlined_call_operand.vmem [shape: bf16[32,96], index: 8, kind: input, shape index: {}]   ;;  %s3357_s9 = inlined_call_operand.vmem [shape: f32[1,96], index: 9, kind: input, shape index: {}]   ;;  %s3358_s10 = inlined_call_operand.vmem [shape: bf16[32,96], index: 10, kind: input, shape index: {}]   ;;  %s3359_s11 = inlined_call_operand.vmem [shape: f32[1,32], index: 11, kind: input, shape index: {}]   ;;  %s3360_s12 = inlined_call_operand.vmem [shape: f32[8,2,32], index: 12, kind: output, shape index: {0}]   ;;  %s3361_s13 = inlined_call_operand.hbm [shape: f32[2,2,32], index: 13, kind: output, shape index: {1}]  }
   0x1   :  { %v2728_v0 = vld [vmem:[%s3348_s0] sm:$0x3]  ;;  %v2733_v1 = vld [vmem:[%s3348_s0 + $0x2] sm:$0x3]  ;;  %v2738_v3 = vld [vmem:[%s3348_s0 + $0x4] sm:$0x3]  ;;  %v64_v6 = vunpack.c.l.s4 %v2642_v5 }
   0x2   :  { %v2743_v4 = vld [vmem:[%s3348_s0 + $0x6] sm:$0x3]  ;;  %v2745_v7 = vshrl.u32 %v66_v2, 7  ;;  %v2750_v8 = vld [vmem:[%s3348_s0 + $0x8] sm:$0x3]  ;;  %v61_v10 = vcombine.low %v2728_v0, %v2733_v1 }
   0x3   :  { %v2755_v9 = vld [vmem:[%s3348_s0 + $0xa] sm:$0x3]  ;;  %v2762_v11 = vld [vmem:[%s3348_s0 + $0xc] sm:$0x3]  ;;  %v2767_v12 = vld [vmem:[%s3348_s0 + $0xe] sm:$0x3]  ;;  %v62_v13 = vcombine.low %v2738_v3, %v2743_v4  ;;  %v65_v14 = vunpack.c.0.s8 %v64_v6 }
   0x4   :  { %v78_v15 = vcombine.low %v2750_v8, %v2755_v9  ;;  %v79_v16 = vcombine.low %v2762_v11, %v2767_v12 }
   0x5   :  { %v2776_v17 = vsub.s32 %v65_v14, %v2745_v7 }
   0x7   :  { %v69_v18 = vrot.slane %v61_v10, %v2776_v17  ;;  %v76_v19 = vrot.slane %v62_v13, %v2776_v17  ;;  %v86_v20 = vrot.slane %v78_v15, %v2776_v17  ;;  %v93_v21 = vrot.slane %v79_v16, %v2776_v17 }
   0x9   :  { %v77_v22 = vcombine.low %v69_v18, %v76_v19  ;;  %v94_v23 = vcombine.low %v86_v20, %v93_v21 }
   0xa   :  { %19 = vsyncpa [#allocation5], 0  ;;  %v2787_v26 = vld [vmem:[%s3354_s6] sm:$0xff]   ;;  %v2643_v27 = vmov 0.0   ;;  %vm2644_vm1 = vmmov 0   ;;  %v2796_v28 = vld [vmem:[%s3354_s6 + $0x8] sm:$0xff]  }
   0xb   :  { %v98_v24 = vsel %vm97_vm0, %v77_v22, 0.0  ;;  %v101_v25 = vsel %vm97_vm0, %v94_v23, 0.0  ;;  %2360 = vmatprep.subr.bf16.mxu1 %v2643_v27  ;;  %2364 = vmatprep.mubr.msk.bf16.mxu1 %vm2644_vm1, %v2643_v27  ;;  %v2801_v29 = vld [vmem:[%s3351_s3] sm:$0x3]  ;;  %vm582_vm2 = vcmask 261120   ;;  %vm464_vm3 = vcmask 1043456  }
   0xc   :  { %99 = vadd.xlane.f32.xlu0 %v98_v24  ;;  %2361 = vmatpush3.bf16.msra.mxu1 %v2787_v26  ;;  %v569_v30 = vpack.c.bf16 %v2801_v29, %v2801_v29  ;;  %v2645_v31 = vmov 269488144   ;;  %v2646_v33 = vmov 842150450   ;;  %v2647_v35 = vmov 1414812756  }
   0xd   :  { %2350 = vmatprep.subr.bf16.mxu0 %v2643_v27  ;;  %2362 = vmatprep.subr.bf16.mxu1 %v2643_v27  ;;  %v110_v32 = vunpack.c.l.s4 %v2645_v31  ;;  %v117_v34 = vunpack.c.l.s4 %v2646_v33  ;;  %v124_v36 = vunpack.c.l.s4 %v2647_v35  ;;  %v2648_v37 = vmov 1987475062   ;;  %v2513_v31 = vld [vmem:[%s3352_s4 + $0x10] ss:$0 sps:$4 sm:$0xff]   ;;  %v2249_v33 = vld [vmem:[%s3355_s7] ss:$0 sm:$0xff] }
   0xe   :  { %2356 = vmatprep.mubr.msk.bf16.mxu0 %vm2644_vm1, %v2643_v27  ;;  %v131_v38 = vunpack.c.l.s4 %v2648_v37  ;;  %s2649_s19 = smov 64   ;;  %s2650_s20 = smov 32   ;;  %vm553_vm4 = vcmask 779264   ;;  %vm684_vm5 = vcmask 253952   ;;  %vm1355_vm6 = vcmask 254976  }
   0xf   :  { %v111_v39 = vunpack.c.0.s8 %v110_v32  ;;  %v118_v40 = vunpack.c.0.s8 %v117_v34  ;;  %v125_v41 = vunpack.c.0.s8 %v124_v36  ;;  %v466_v32 = vsel %vm464_vm3, %v2513_v31, 0 }
  0x10   :  { %102 = vadd.xlane.f32.xlu0 %v101_v25  ;;  %2363 = vmatpush3.bf16.msra.mxu1 %v2796_v28  ;;  %v132_v42 = vunpack.c.0.s8 %v131_v38  ;;  %v2511_v25 = vld [vmem:[%s3352_s4] sm:$0xff]  }
  0x11   :  { %2368 = vmatprep.subr.bf16.mxu1 %v2643_v27  ;;  %v2819_v43 = vsub.s32 %v111_v39, %v2745_v7  ;;  %v2822_v44 = vsub.s32 %v118_v40, %v2745_v7  ;;  %v2825_v45 = vsub.s32 %v125_v41, %v2745_v7  ;;  %2351 = vmatpush3.bf16.msra.mxu0 %v2511_v25 }
  0x12   :  { %v2828_v46 = vsub.s32 %v132_v42, %v2745_v7  ;;  %2352 = vmatprep.subr.bf16.mxu0 %v2643_v27 }
  0x13   :  { %2365 = vmatmul.mubr.msk.bf16.vlgmr.msra.gmra.mrb[0].mxu1 %vm582_vm2, %v569_v30  ;;  %v2512_v30 = vld [vmem:[%s3352_s4 + $0x8] sm:$0xff]  }
  0x14   :  { %2369 = vmatpush3.bf16.msra.mxu1 %v2787_v26  ;;  %2372 = vmatprep.mubr.msk.bf16.mxu1 %vm2644_vm1, %v2643_v27 }
  0x15   :  { %2370 = vmatprep.subr.bf16.mxu1 %v2643_v27  ;;  %2353 = vmatpush3.bf16.msra.mxu0 %v2512_v30 }
  0x16   :  { %2354 = vmatprep.subr.bf16.mxu0 %v2643_v27 }
  0x18   :  { %2371 = vmatpush3.bf16.msra.mxu1 %v2796_v28 }
  0x19   :  { %2384 = vmatprep.subr.bf16.mxu1 %v2643_v27  ;;  %2355 = vmatpush3.bf16.msra.mxu0 %v466_v32 }
  0x1a   :  { %2376 = vmatprep.subr.bf16.mxu0 %v2643_v27 }
  0x26   :  { %638 = vrot.lane.b32.xlu0 %v2249_v33, %s2649_s19 }
  0x2a   :  { %660 = vrot.lane.b32.xlu0 %v2801_v29, %s2650_s20  ;;  %v2239_v29 = vld [vmem:[%s3350_s2] ss:$0 sm:$0xff]  ;;  %s2653_s2 = smov [#allocation4]  }
  0x2b   :  { %s2225_s23 = sshll.u32 %s2653_s2, 4  ;;  %s2226_s23 = int_to_ptr.vmem [resolvable:$true] %s2225_s23 }
  0x2c   :  { %s2618_s25 = scalar_lea.vmem %s2226_s23, 64  ;;  %p2623_p1 = scmp.lt.s32.totalorder %s2226_s23, %s2226_s23 }
  0x2d   :  { %p2619_p0 = scmp.ne.s32.totalorder %s2226_s23, %s2618_s25  ;;  %p2624_p2 = scmp.lt.s32.totalorder %s2618_s25, %s2618_s25 }
  0x2f   :  { %p2625_p3 = por %p2624_p2, %p2623_p1 }
  0x31   :  { %p2626_p4 = pnand %p2625_p3, %p2619_p0 }
  0x99   :  { %v100_v47 = vpop.xlane.xlu0 %99 }
  0x9a   :  { %v105_v48 = vmul.f32 0.025, %v100_v47  ;;  %v2238_v47 = vld [vmem:[%s3349_s1] ss:$0 sm:$0xff] }
  0x9c   :  { %v115_v49 = vrot.slane %v105_v48, %v2819_v43  ;;  %v122_v50 = vrot.slane %v105_v48, %v2822_v44  ;;  %v129_v51 = vrot.slane %v105_v48, %v2825_v45  ;;  %v136_v52 = vrot.slane %v105_v48, %v2828_v46 }
  0x9d   :  { %v103_v53 = vpop.xlane.xlu0 %102 }
  0x9e   :  { %v106_v54 = vmul.f32 0.025, %v103_v53  ;;  %v2835_v55 = vsub.f32 %v2728_v0, %v115_v49  ;;  %v2838_v56 = vsub.f32 %v2733_v1, %v122_v50  ;;  %v2841_v57 = vsub.f32 %v2738_v3, %v129_v51 }
  0x9f   :  { %v2844_v58 = vsub.f32 %v2743_v4, %v136_v52  ;;  %v325_v49 = vcombine.high %v2238_v47, %v2238_v47  ;;  %v360_v50 = vcombine.high %v2239_v29, %v2239_v29  ;;  %v332_v51 = vrot.slane %v2238_v47, %v2776_v17 }
  0xa0   :  { %v143_v59 = vrot.slane %v106_v54, %v2819_v43  ;;  %v150_v60 = vrot.slane %v106_v54, %v2822_v44  ;;  %v157_v61 = vrot.slane %v106_v54, %v2825_v45  ;;  %v164_v62 = vrot.slane %v106_v54, %v2828_v46 }
  0xa1   :  { %v181_v63 = vmul.f32 %v2835_v55, %v2835_v55  ;;  %v182_v0 = vmul.f32 %v2838_v56, %v2838_v56  ;;  %v183_v1 = vmul.f32 %v2841_v57, %v2841_v57  ;;  %v184_v2 = vmul.f32 %v2844_v58, %v2844_v58  ;;  %v2930_v25 = vpop.permute.xlu0 %638 }
  0xa2   :  { %v2859_v3 = vsub.f32 %v2750_v8, %v143_v59  ;;  %v2862_v4 = vsub.f32 %v2755_v9, %v150_v60  ;;  %v2865_v5 = vsub.f32 %v2762_v11, %v157_v61  ;;  %v2868_v6 = vsub.f32 %v2767_v12, %v164_v62 }
  0xa3   :  { %v197_v10 = vcombine.low %v181_v63, %v182_v0  ;;  %v198_v13 = vcombine.low %v183_v1, %v184_v2  ;;  %v339_v52 = vrot.slane %v325_v49, %v2776_v17  ;;  %v367_v54 = vrot.slane %v2239_v29, %v2776_v17  ;;  %v2240_v29 = vld [vmem:[%s3353_s5] ss:$0 sm:$0xff]  ;;  %s2651_s5 = smov 96  }
  0xa4   :  { %v185_v14 = vmul.f32 %v2859_v3, %v2859_v3  ;;  %v186_v15 = vmul.f32 %v2862_v4, %v2862_v4  ;;  %v187_v8 = vmul.f32 %v2865_v5, %v2865_v5  ;;  %v188_v9 = vmul.f32 %v2868_v6, %v2868_v6 }
  0xa5   :  { %v205_v11 = vrot.slane %v197_v10, %v2776_v17  ;;  %v212_v16 = vrot.slane %v198_v13, %v2776_v17  ;;  %v374_v59 = vrot.slane %v360_v50, %v2776_v17  ;;  %v340_v0 = vcombine.high %v332_v51, %v332_v51 }
  0xa6   :  { %v214_v12 = vcombine.low %v185_v14, %v186_v15  ;;  %v215_v18 = vcombine.low %v187_v8, %v188_v9  ;;  %v341_v1 = vcombine.high %v339_v52, %v339_v52  ;;  %v375_v8 = vcombine.high %v367_v54, %v367_v54 }
  0xa7   :  { %v213_v19 = vcombine.low %v205_v11, %v212_v16  ;;  %v376_v9 = vcombine.high %v374_v59, %v374_v59 }
  0xa8   :  { %v222_v20 = vrot.slane %v214_v12, %v2776_v17  ;;  %v229_v21 = vrot.slane %v215_v18, %v2776_v17 }
  0xa9   :  { %v233_v22 = vsel %vm97_vm0, %v213_v19, 0.0 }
  0xaa   :  { %234 = vadd.xlane.f32.xlu1 %v233_v22  ;;  %v230_v23 = vcombine.low %v222_v20, %v229_v21 }
  0xac   :  { %v236_v24 = vsel %vm97_vm0, %v230_v23, 0.0 }
  0xae   :  { %237 = vadd.xlane.f32.xlu1 %v236_v24 }
  0xe6   :  { %v2902_v34 = vpop.f32.mrb[0].mxu1 }
  0xe7   :  { %v2366_v35 = vpop.f32.mrb[1].mxu1 }
  0xe8   :  { %v623_v36 = vpop.f32.mrb[2].mxu1 }
  0xe9   :  { %v2367_v37 = vpop.f32.mrb[3].mxu1 }
 0x137   :  { %v235_v38 = vpop.xlane.xlu1 %234 }
 0x138   :  { %v239_v39 = vmul.f32 0.025, %v235_v38 }
 0x13a   :  { %v241_v40 = vadd.f32 1e-05, %v239_v39 }
 0x13b   :  { %v238_v41 = vpop.xlane.xlu1 %237 }
 0x13c   :  { %2518 = vrsqrt.f32 %v241_v40  ;;  %v240_v42 = vmul.f32 0.025, %v238_v41 }
 0x13e   :  { %v242_v48 = vadd.f32 1e-05, %v240_v42 }
 0x140   :  { %2520 = vrsqrt.f32 %v242_v48 }
 0x146   :  { %v2519_v53 = vpop.eup %2518 }
 0x147   :  { %v253_v60 = vrot.slane %v2519_v53, %v2819_v43  ;;  %v260_v61 = vrot.slane %v2519_v53, %v2822_v44  ;;  %v267_v62 = vrot.slane %v2519_v53, %v2825_v45  ;;  %v274_v63 = vrot.slane %v2519_v53, %v2828_v46 }
 0x149   :  { %v311_v2 = vmul.f32 %v253_v60, %v2835_v55  ;;  %v312_v10 = vmul.f32 %v260_v61, %v2838_v56  ;;  %v313_v13 = vmul.f32 %v267_v62, %v2841_v57  ;;  %v314_v14 = vmul.f32 %v274_v63, %v2844_v58 }
 0x14a   :  { %v2521_v15 = vpop.eup %2520 }
 0x14b   :  { %v281_v11 = vrot.slane %v2521_v15, %v2819_v43  ;;  %v288_v16 = vrot.slane %v2521_v15, %v2822_v44  ;;  %v295_v12 = vrot.slane %v2521_v15, %v2825_v45  ;;  %v302_v18 = vrot.slane %v2521_v15, %v2828_v46 }
 0x14c   :  { %v346_v19 = vmul.f32 %v332_v51, %v311_v2  ;;  %v347_v20 = vmul.f32 %v340_v0, %v312_v10  ;;  %v348_v55 = vmul.f32 %v339_v52, %v313_v13  ;;  %v349_v21 = vmul.f32 %v341_v1, %v314_v14 }
 0x14d   :  { %v315_v56 = vmul.f32 %v281_v11, %v2859_v3  ;;  %v316_v57 = vmul.f32 %v288_v16, %v2862_v4  ;;  %v317_v58 = vmul.f32 %v295_v12, %v2865_v5  ;;  %v318_v22 = vmul.f32 %v302_v18, %v2868_v6 }
 0x14e   :  { %v381_v23 = vadd.f32 %v367_v54, %v346_v19  ;;  %v382_v43 = vadd.f32 %v375_v8, %v347_v20  ;;  %v383_v24 = vadd.f32 %v374_v59, %v348_v55  ;;  %v384_v44 = vadd.f32 %v376_v9, %v349_v21  ;;  %v661_v21 = vpop.permute.xlu0 %660 }
 0x14f   :  { %v350_v45 = vmul.f32 %v332_v51, %v315_v56  ;;  %v351_v46 = vmul.f32 %v340_v0, %v316_v57  ;;  %v352_v30 = vmul.f32 %v339_v52, %v317_v58  ;;  %v353_v31 = vmul.f32 %v341_v1, %v318_v22 }
 0x150   :  { %v397_v32 = vcombine.low %v381_v23, %v382_v43  ;;  %v398_v33 = vcombine.low %v383_v24, %v384_v44  ;;  %v641_v3 = vadd.f32 %v2930_v25, %v2902_v34 }
 0x151   :  { %v385_v4 = vadd.f32 %v367_v54, %v350_v45  ;;  %v386_v35 = vadd.f32 %v375_v8, %v351_v46  ;;  %v387_v5 = vadd.f32 %v374_v59, %v352_v30  ;;  %v388_v36 = vadd.f32 %v376_v9, %v353_v31 }
 0x152   :  { %643 = vrot.lane.b32.xlu1 %v641_v3, %s2649_s19  ;;  %v405_v6 = vrot.slane %v397_v32, %v2776_v17  ;;  %v412_v37 = vrot.slane %v398_v33, %v2776_v17 }
 0x153   :  { %v414_v38 = vcombine.low %v385_v4, %v386_v35  ;;  %v415_v39 = vcombine.low %v387_v5, %v388_v36 }
 0x154   :  { %v413_v42 = vcombine.low %v405_v6, %v412_v37 }
 0x155   :  { %v422_v40 = vrot.slane %v414_v38, %v2776_v17  ;;  %v429_v41 = vrot.slane %v415_v39, %v2776_v17 }
 0x157   :  { %v430_v47 = vcombine.low %v422_v40, %v429_v41 }
 0x159   :  { %v433_v48 = vpack.c.bf16 %v430_v47, %v413_v42 }
 0x15b   :  { %2357 = vmatmul.mubr.msk.bf16.vlgmr.msra.gmra.mrb[0].mxu0 %vm97_vm0, %v433_v48 }
 0x15c   :  { %2377 = vmatpush3.bf16.msra.mxu0 %v2787_v26  ;;  %2380 = vmatprep.mubr.msk.bf16.mxu0 %vm2644_vm1, %v2643_v27 }
 0x15d   :  { %2378 = vmatprep.subr.bf16.mxu0 %v2643_v27 }
 0x160   :  { %2379 = vmatpush3.bf16.msra.mxu0 %v2796_v28 }
 0x161   :  { %2392 = vmatprep.subr.bf16.mxu0 %v2643_v27 }
 0x1c4   :  { %v644_v16 = vpop.permute.xlu1 %643 }
 0x22e   :  { %v502_v49 = vpop.f32.mrb[0].mxu0 }
 0x22f   :  { %v503_v50 = vadd.f32 %v2240_v29, %v502_v49  ;;  %v2358_v51 = vpop.f32.mrb[1].mxu0 }
 0x230   :  { %v505_v52 = vpop.f32.mrb[2].mxu0 }
 0x231   :  { %v511_v53 = vcombine.high %v503_v50, %v503_v50  ;;  %v518_v54 = vrot.slane %v503_v50, %v2776_v17  ;;  %v506_v59 = vadd.f32 %v2240_v29, %v505_v52  ;;  %v2359_v60 = vpop.f32.mrb[3].mxu0 }
 0x233   :  { %v525_v61 = vrot.slane %v511_v53, %v2776_v17  ;;  %v526_v62 = vcombine.high %v518_v54, %v518_v54  ;;  %554 = vst.msk [vmem:[#allocation2] sm:$0x3] %vm553_vm4, %v518_v54  ;;  %v528_v63 = vcombine.high %v506_v59, %v506_v59  ;;  %v535_v0 = vrot.slane %v506_v59, %v2776_v17 }
 0x235   :  { %v527_v1 = vcombine.high %v525_v61, %v525_v61  ;;  %555 = vst.msk [vmem:[#allocation2 + $0x2] sm:$0x3] %vm553_vm4, %v526_v62  ;;  %556 = vst.msk [vmem:[#allocation2 + $0x4] sm:$0x3] %vm553_vm4, %v525_v61  ;;  %v542_v2 = vrot.slane %v528_v63, %v2776_v17  ;;  %v543_v10 = vcombine.high %v535_v0, %v535_v0 }
 0x236   :  { %558 = vst.msk [vmem:[#allocation2 + $0x8] sm:$0x3] %vm553_vm4, %v535_v0 }
 0x237   :  { %557 = vst.msk [vmem:[#allocation2 + $0x6] sm:$0x3] %vm553_vm4, %v527_v1  ;;  %v544_v13 = vcombine.high %v542_v2, %v542_v2  ;;  %559 = vst.msk [vmem:[#allocation2 + $0xa] sm:$0x3] %vm553_vm4, %v543_v10 }
 0x238   :  { %560 = vst.msk [vmem:[#allocation2 + $0xc] sm:$0x3] %vm553_vm4, %v542_v2 }
 0x239   :  { %561 = vst.msk [vmem:[#allocation2 + $0xe] sm:$0x3] %vm553_vm4, %v544_v13 }
 0x23a   :  { %v568_v14 = vld [vmem:[#allocation2] sm:$0x3] }
 0x23b   :  { %v626_v15 = vadd.f32 %v2902_v34, %v568_v14 }
 0x23c   :  { %v687_v31 = vld [vmem:[#allocation2 + $0x2] sm:$0x3]  ;;  %v782_v54 = vld [vmem:[#allocation2 + $0x4] sm:$0x3] }
 0x23d   :  { %v2248_v8 = vmul.f32 -1.442695, %v626_v15 }
 0x23f   :  { %2522 = vpow2.f32 %v2248_v8 }
 0x249   :  { %v2523_v9 = vpop.eup %2522 }
 0x24a   :  { %v630_v11 = vadd.f32 1.0, %v2523_v9 }
 0x24c   :  { %2524 = vrcp.f32 %v630_v11 }
 0x256   :  { %v2525_v12 = vpop.eup %2524 }
 0x257   :  { %v646_v18 = vmul.f32 %v2525_v12, %v644_v16  ;;  %v653_v56 = vsub.f32 1.0, %v2525_v12  ;;  %v663_v57 = vmul.f32 %v2525_v12, %v661_v21 }
 0x259   :  { %648 = vrot.lane.b32.xlu1 %v646_v18, %s2649_s19 }
 0x2cb   :  { %v649_v19 = vpop.permute.xlu1 %648 }
 0x2cc   :  { %v651_v20 = vadd.f32 %v649_v19, %v568_v14 }
 0x2ce   :  { %2526 = vtanh.f32 %v651_v20 }
 0x2d8   :  { %v2527_v55 = vpop.eup %2526 }
 0x2d9   :  { %655 = vrot.lane.b32.xlu1 %v2527_v55, %s2651_s5 }
 0x34b   :  { %v656_v34 = vpop.permute.xlu1 %655 }
 0x34c   :  { %v658_v58 = vmul.f32 %v656_v34, %v653_v56  ;;  %v877_v56 = vld [vmem:[#allocation2 + $0x6] sm:$0x3] }
 0x34e   :  { %v664_v22 = vadd.f32 %v663_v57, %v658_v58 }
 0x350   :  { %v2964_v23 = vpack.c.bf16 %v664_v22, %v664_v22 }
 0x352   :  { %688 = vrot.lane.b32.xlu1 %v2964_v23, %s2651_s5 }
 0x3c4   :  { %v689_v43 = vpop.permute.xlu1 %688 }
 0x3c5   :  { %2373 = vmatmul.mubr.msk.bf16.vlgmr.msra.gmra.mrb[4].mxu1 %vm582_vm2, %v689_v43 }
 0x3c6   :  { %2385 = vmatpush3.bf16.msra.mxu1 %v2787_v26  ;;  %2388 = vmatprep.mubr.msk.bf16.mxu1 %vm2644_vm1, %v2643_v27 }
 0x3c7   :  { %2386 = vmatprep.subr.bf16.mxu1 %v2643_v27 }
 0x3ca   :  { %2387 = vmatpush3.bf16.msra.mxu1 %v2796_v28 }
 0x3cb   :  { %2400 = vmatprep.subr.bf16.mxu1 %v2643_v27 }
 0x498   :  { %v727_v24 = vpop.f32.mrb[4].mxu1 }
 0x499   :  { %v740_v44 = vadd.f32 %v727_v24, %v2930_v25  ;;  %v2374_v45 = vpop.f32.mrb[5].mxu1  ;;  %v733_v32 = vadd.f32 %v727_v24, %v687_v31 }
 0x49a   :  { %v730_v46 = vpop.f32.mrb[6].mxu1 }
 0x49b   :  { %742 = vrot.lane.b32.xlu0 %v740_v44, %s2649_s19  ;;  %v2375_v30 = vpop.f32.mrb[7].mxu1  ;;  %v2251_v33 = vmul.f32 -1.442695, %v733_v32 }
 0x49d   :  { %2528 = vpow2.f32 %v2251_v33 }
 0x4a7   :  { %v2529_v3 = vpop.eup %2528 }
 0x4a8   :  { %v737_v4 = vadd.f32 1.0, %v2529_v3 }
 0x4aa   :  { %2530 = vrcp.f32 %v737_v4 }
 0x4b4   :  { %v2531_v35 = vpop.eup %2530 }
 0x4b5   :  { %v752_v39 = vsub.f32 1.0, %v2531_v35  ;;  %v758_v41 = vmul.f32 %v2531_v35, %v664_v22 }
 0x50d   :  { %v743_v5 = vpop.permute.xlu0 %742 }
 0x50e   :  { %v745_v36 = vmul.f32 %v2531_v35, %v743_v5 }
 0x510   :  { %747 = vrot.lane.b32.xlu1 %v745_v36, %s2649_s19 }
 0x582   :  { %v748_v6 = vpop.permute.xlu1 %747 }
 0x583   :  { %v750_v37 = vadd.f32 %v748_v6, %v687_v31 }
 0x585   :  { %2532 = vtanh.f32 %v750_v37 }
 0x58f   :  { %v2533_v38 = vpop.eup %2532 }
 0x590   :  { %754 = vrot.lane.b32.xlu0 %v2533_v38, %s2651_s5 }
 0x602   :  { %v755_v40 = vpop.permute.xlu0 %754 }
 0x603   :  { %v757_v42 = vmul.f32 %v755_v40, %v752_v39  ;;  %v972_v40 = vld [vmem:[#allocation2 + $0x8] sm:$0x3] }
 0x605   :  { %v759_v47 = vadd.f32 %v758_v41, %v757_v42 }
 0x607   :  { %v2979_v48 = vpack.c.bf16 %v759_v47, %v759_v47 }
 0x609   :  { %783 = vrot.lane.b32.xlu1 %v2979_v48, %s2651_s5 }
 0x67b   :  { %v784_v29 = vpop.permute.xlu1 %783 }
 0x67c   :  { %2381 = vmatmul.mubr.msk.bf16.vlgmr.msra.gmra.mrb[4].mxu0 %vm582_vm2, %v784_v29 }
 0x67d   :  { %2393 = vmatpush3.bf16.msra.mxu0 %v2787_v26  ;;  %2396 = vmatprep.mubr.msk.bf16.mxu0 %vm2644_vm1, %v2643_v27 }
 0x67e   :  { %2394 = vmatprep.subr.bf16.mxu0 %v2643_v27 }
 0x681   :  { %2395 = vmatpush3.bf16.msra.mxu0 %v2796_v28 }
 0x682   :  { %2408 = vmatprep.subr.bf16.mxu0 %v2643_v27 }
 0x74f   :  { %v822_v49 = vpop.f32.mrb[4].mxu0 }
 0x750   :  { %v835_v50 = vadd.f32 %v822_v49, %v2930_v25  ;;  %v2382_v51 = vpop.f32.mrb[5].mxu0  ;;  %v828_v59 = vadd.f32 %v822_v49, %v782_v54 }
 0x751   :  { %v825_v52 = vpop.f32.mrb[6].mxu0 }
 0x752   :  { %837 = vrot.lane.b32.xlu0 %v835_v50, %s2649_s19  ;;  %v2383_v53 = vpop.f32.mrb[7].mxu0  ;;  %v2253_v60 = vmul.f32 -1.442695, %v828_v59 }
 0x754   :  { %2534 = vpow2.f32 %v2253_v60 }
 0x75e   :  { %v2535_v61 = vpop.eup %2534 }
 0x75f   :  { %v832_v62 = vadd.f32 1.0, %v2535_v61 }
 0x761   :  { %2536 = vrcp.f32 %v832_v62 }
 0x76b   :  { %v2537_v63 = vpop.eup %2536 }
 0x76c   :  { %v847_v14 = vsub.f32 1.0, %v2537_v63  ;;  %v853_v8 = vmul.f32 %v2537_v63, %v759_v47 }
 0x7c4   :  { %v838_v0 = vpop.permute.xlu0 %837 }
 0x7c5   :  { %v840_v1 = vmul.f32 %v2537_v63, %v838_v0 }
 0x7c7   :  { %842 = vrot.lane.b32.xlu1 %v840_v1, %s2649_s19 }
 0x839   :  { %v843_v2 = vpop.permute.xlu1 %842 }
 0x83a   :  { %v845_v10 = vadd.f32 %v843_v2, %v782_v54 }
 0x83c   :  { %2538 = vtanh.f32 %v845_v10 }
 0x846   :  { %v2539_v13 = vpop.eup %2538 }
 0x847   :  { %849 = vrot.lane.b32.xlu0 %v2539_v13, %s2651_s5 }
 0x8b9   :  { %v850_v15 = vpop.permute.xlu0 %849 }
 0x8ba   :  { %v852_v9 = vmul.f32 %v850_v15, %v847_v14 }
 0x8bc   :  { %v854_v11 = vadd.f32 %v853_v8, %v852_v9  ;;  %v1067_v8 = vld [vmem:[#allocation2 + $0xa] sm:$0x3] }
 0x8be   :  { %v2994_v16 = vpack.c.bf16 %v854_v11, %v854_v11 }
 0x8c0   :  { %878 = vrot.lane.b32.xlu1 %v2994_v16, %s2651_s5 }
 0x932   :  { %v879_v12 = vpop.permute.xlu1 %878 }
 0x933   :  { %2389 = vmatmul.mubr.msk.bf16.vlgmr.msra.gmra.mrb[8].mxu1 %vm582_vm2, %v879_v12 }
 0x934   :  { %2401 = vmatpush3.bf16.msra.mxu1 %v2787_v26  ;;  %2404 = vmatprep.mubr.msk.bf16.mxu1 %vm2644_vm1, %v2643_v27 }
 0x935   :  { %2402 = vmatprep.subr.bf16.mxu1 %v2643_v27 }
 0x938   :  { %2403 = vmatpush3.bf16.msra.mxu1 %v2796_v28 }
 0x939   :  { %2416 = vmatprep.subr.bf16.mxu1 %v2643_v27 }
 0xa06   :  { %v917_v18 = vpop.f32.mrb[8].mxu1 }
 0xa07   :  { %v930_v19 = vadd.f32 %v917_v18, %v2930_v25  ;;  %v2390_v20 = vpop.f32.mrb[9].mxu1  ;;  %v923_v34 = vadd.f32 %v917_v18, %v877_v56 }
 0xa08   :  { %v920_v55 = vpop.f32.mrb[10].mxu1 }
 0xa09   :  { %932 = vrot.lane.b32.xlu0 %v930_v19, %s2649_s19  ;;  %v2391_v21 = vpop.f32.mrb[11].mxu1  ;;  %v2255_v57 = vmul.f32 -1.442695, %v923_v34 }
 0xa0b   :  { %2540 = vpow2.f32 %v2255_v57 }
 0xa15   :  { %v2541_v58 = vpop.eup %2540 }
 0xa16   :  { %v927_v22 = vadd.f32 1.0, %v2541_v58 }
 0xa18   :  { %2542 = vrcp.f32 %v927_v22 }
 0xa22   :  { %v2543_v43 = vpop.eup %2542 }
 0xa23   :  { %v942_v31 = vsub.f32 1.0, %v2543_v43  ;;  %v948_v33 = vmul.f32 %v2543_v43, %v854_v11 }
 0xa7b   :  { %v933_v24 = vpop.permute.xlu0 %932 }
 0xa7c   :  { %v935_v44 = vmul.f32 %v2543_v43, %v933_v24 }
 0xa7e   :  { %937 = vrot.lane.b32.xlu1 %v935_v44, %s2649_s19 }
 0xaf0   :  { %v938_v45 = vpop.permute.xlu1 %937 }
 0xaf1   :  { %v940_v46 = vadd.f32 %v938_v45, %v877_v56 }
 0xaf3   :  { %2544 = vtanh.f32 %v940_v46 }
 0xafd   :  { %v2545_v30 = vpop.eup %2544 }
 0xafe   :  { %944 = vrot.lane.b32.xlu0 %v2545_v30, %s2651_s5 }
 0xb70   :  { %v945_v32 = vpop.permute.xlu0 %944 }
 0xb71   :  { %v947_v3 = vmul.f32 %v945_v32, %v942_v31  ;;  %v1162_v32 = vld [vmem:[#allocation2 + $0xc] sm:$0x3] }
 0xb73   :  { %v949_v4 = vadd.f32 %v948_v33, %v947_v3 }
 0xb75   :  { %v3009_v35 = vpack.c.bf16 %v949_v4, %v949_v4 }
 0xb77   :  { %973 = vrot.lane.b32.xlu1 %v3009_v35, %s2651_s5 }
 0xbe9   :  { %v974_v5 = vpop.permute.xlu1 %973 }
 0xbea   :  { %2397 = vmatmul.mubr.msk.bf16.vlgmr.msra.gmra.mrb[8].mxu0 %vm582_vm2, %v974_v5 }
 0xbeb   :  { %2409 = vmatpush3.bf16.msra.mxu0 %v2787_v26  ;;  %2412 = vmatprep.mubr.msk.bf16.mxu0 %vm2644_vm1, %v2643_v27 }
 0xbec   :  { %2410 = vmatprep.subr.bf16.mxu0 %v2643_v27 }
 0xbef   :  { %2411 = vmatpush3.bf16.msra.mxu0 %v2796_v28 }
 0xbf0   :  { %2424 = vmatprep.subr.bf16.mxu0 %v2643_v27 }
 0xcbd   :  { %v1012_v36 = vpop.f32.mrb[8].mxu0 }
 0xcbe   :  { %v1025_v6 = vadd.f32 %v1012_v36, %v2930_v25  ;;  %v2398_v37 = vpop.f32.mrb[9].mxu0  ;;  %v1018_v41 = vadd.f32 %v1012_v36, %v972_v40 }
 0xcbf   :  { %v1015_v38 = vpop.f32.mrb[10].mxu0 }
 0xcc0   :  { %1027 = vrot.lane.b32.xlu0 %v1025_v6, %s2649_s19  ;;  %v2399_v39 = vpop.f32.mrb[11].mxu0  ;;  %v2257_v42 = vmul.f32 -1.442695, %v1018_v41 }
 0xcc2   :  { %2546 = vpow2.f32 %v2257_v42 }
 0xccc   :  { %v2547_v47 = vpop.eup %2546 }
 0xccd   :  { %v1022_v29 = vadd.f32 1.0, %v2547_v47 }
 0xccf   :  { %2548 = vrcp.f32 %v1022_v29 }
 0xcd9   :  { %v2549_v49 = vpop.eup %2548 }
 0xcda   :  { %v1037_v59 = vsub.f32 1.0, %v2549_v49  ;;  %v1043_v61 = vmul.f32 %v2549_v49, %v949_v4 }
 0xd32   :  { %v1028_v50 = vpop.permute.xlu0 %1027 }
 0xd33   :  { %v1030_v51 = vmul.f32 %v2549_v49, %v1028_v50 }
 0xd35   :  { %1032 = vrot.lane.b32.xlu1 %v1030_v51, %s2649_s19 }
 0xda7   :  { %v1033_v52 = vpop.permute.xlu1 %1032 }
 0xda8   :  { %v1035_v53 = vadd.f32 %v1033_v52, %v972_v40 }
 0xdaa   :  { %2550 = vtanh.f32 %v1035_v53 }
 0xdb4   :  { %v2551_v54 = vpop.eup %2550 }
 0xdb5   :  { %1039 = vrot.lane.b32.xlu0 %v2551_v54, %s2651_s5 }
 0xe27   :  { %v1040_v60 = vpop.permute.xlu0 %1039 }
 0xe28   :  { %v1042_v62 = vmul.f32 %v1040_v60, %v1037_v59 }
 0xe2a   :  { %v1044_v63 = vadd.f32 %v1043_v61, %v1042_v62  ;;  %v1257_v61 = vld [vmem:[#allocation2 + $0xe] sm:$0x3] }
 0xe2c   :  { %v3024_v0 = vpack.c.bf16 %v1044_v63, %v1044_v63 }
 0xe2e   :  { %1068 = vrot.lane.b32.xlu1 %v3024_v0, %s2651_s5 }
 0xea0   :  { %v1069_v1 = vpop.permute.xlu1 %1068 }
 0xea1   :  { %2405 = vmatmul.mubr.msk.bf16.vlgmr.msra.gmra.mrb[12].mxu1 %vm582_vm2, %v1069_v1 }
 0xea2   :  { %2417 = vmatpush3.bf16.msra.mxu1 %v2787_v26  ;;  %2420 = vmatprep.mubr.msk.bf16.mxu1 %vm2644_vm1, %v2643_v27 }
 0xea3   :  { %2418 = vmatprep.subr.bf16.mxu1 %v2643_v27 }
 0xea6   :  { %2419 = vmatpush3.bf16.msra.mxu1 %v2796_v28 }
 0xea7   :  { %2432 = vmatprep.subr.bf16.mxu1 %v2643_v27 }
 0xf74   :  { %v1107_v2 = vpop.f32.mrb[12].mxu1 }
 0xf75   :  { %v1120_v10 = vadd.f32 %v1107_v2, %v2930_v25  ;;  %v2406_v13 = vpop.f32.mrb[13].mxu1  ;;  %v1113_v9 = vadd.f32 %v1107_v2, %v1067_v8 }
 0xf76   :  { %v1110_v14 = vpop.f32.mrb[14].mxu1 }
 0xf77   :  { %1122 = vrot.lane.b32.xlu0 %v1120_v10, %s2649_s19  ;;  %v2407_v15 = vpop.f32.mrb[15].mxu1  ;;  %v2259_v26 = vmul.f32 -1.442695, %v1113_v9  ;;  %v2652_v10 = vmov 1966171168  }
 0xf78   :  { %v668_v13 = vunpack.c.l.s4 %v2652_v10 }
 0xf79   :  { %2552 = vpow2.f32 %v2259_v26 }
 0xf7a   :  { %v669_v14 = vunpack.c.0.s8 %v668_v13 }
 0xf7c   :  { %v3061_v15 = vsub.s32 %v669_v14, %v2745_v7 }
 0xf7e   :  { %v673_v26 = vrot.slane %v2964_v23, %v3061_v15  ;;  %v1053_v7 = vrot.slane %v3024_v0, %v3061_v15 }
 0xf83   :  { %v2553_v11 = vpop.eup %2552 }
 0xf84   :  { %v1117_v12 = vadd.f32 1.0, %v2553_v11  ;;  %v680_v11 = vrot.slane %v673_v26, %v3061_v15 }
 0xf86   :  { %2554 = vrcp.f32 %v1117_v12  ;;  %v863_v12 = vrot.slane %v2994_v16, %v3061_v15 }
 0xf90   :  { %v2555_v18 = vpop.eup %2554 }
 0xf91   :  { %v1132_v56 = vsub.f32 1.0, %v2555_v18  ;;  %v1138_v57 = vmul.f32 %v2555_v18, %v1044_v63 }
 0xfe9   :  { %v1123_v19 = vpop.permute.xlu0 %1122 }
 0xfea   :  { %v1125_v28 = vmul.f32 %v2555_v18, %v1123_v19  ;;  %v870_v18 = vrot.slane %v863_v12, %v3061_v15  ;;  %v1060_v19 = vrot.slane %v1053_v7, %v3061_v15 }
 0xfec   :  { %1127 = vrot.lane.b32.xlu1 %v1125_v28, %s2649_s19 }
0x105e   :  { %v1128_v20 = vpop.permute.xlu1 %1127 }
0x105f   :  { %v1130_v55 = vadd.f32 %v1128_v20, %v1067_v8 }
0x1061   :  { %2556 = vtanh.f32 %v1130_v55 }
0x106b   :  { %v2557_v21 = vpop.eup %2556 }
0x106c   :  { %1134 = vrot.lane.b32.xlu0 %v2557_v21, %s2651_s5 }
0x10de   :  { %v1135_v34 = vpop.permute.xlu0 %1134 }
0x10df   :  { %v1137_v58 = vmul.f32 %v1135_v34, %v1132_v56  ;;  %v768_v56 = vrot.slane %v2979_v48, %v3061_v15  ;;  %v3099_v48 = vld [vmem:[%s3351_s3 + $0x2] sm:$0x3] }
0x10e1   :  { %v1139_v22 = vadd.f32 %v1138_v57, %v1137_v58  ;;  %v3087_v57 = vld [vmem:[%s3358_s10] sm:$0xff]   ;;  %v3094_v58 = vld [vmem:[%s3358_s10 + $0x8] sm:$0xff]  }
0x10e3   :  { %v3039_v43 = vpack.c.bf16 %v1139_v22, %v1139_v22 }
0x10e5   :  { %1163 = vrot.lane.b32.xlu1 %v3039_v43, %s2651_s5 }
0x1157   :  { %v1164_v24 = vpop.permute.xlu1 %1163 }
0x1158   :  { %2413 = vmatmul.mubr.msk.bf16.vlgmr.msra.gmra.mrb[12].mxu0 %vm582_vm2, %v1164_v24  ;;  %v775_v24 = vrot.slane %v768_v56, %v3061_v15 }
0x1159   :  { %2428 = vmatprep.mubr.msk.bf16.mxu0 %vm2644_vm1, %v2643_v27 }
0x122b   :  { %v1202_v44 = vpop.f32.mrb[12].mxu0 }
0x122c   :  { %v1215_v45 = vadd.f32 %v1202_v44, %v2930_v25  ;;  %v2414_v46 = vpop.f32.mrb[13].mxu0  ;;  %v1208_v33 = vadd.f32 %v1202_v44, %v1162_v32  ;;  %v958_v44 = vrot.slane %v3009_v35, %v3061_v15 }
0x122d   :  { %v1205_v30 = vpop.f32.mrb[14].mxu0 }
0x122e   :  { %1217 = vrot.lane.b32.xlu0 %v1215_v45, %s2649_s19  ;;  %v2415_v31 = vpop.f32.mrb[15].mxu0  ;;  %v2261_v3 = vmul.f32 -1.442695, %v1208_v33  ;;  %v1549_v45 = vpack.c.bf16 %v3099_v48, %v3099_v48  ;;  %v965_v46 = vrot.slane %v958_v44, %v3061_v15  ;;  %v1148_v30 = vrot.slane %v3039_v43, %v3061_v15  ;;  %v2516_v43 = vld [vmem:[%s3356_s8] sm:$0xff]   ;;  %v2517_v33 = vld [vmem:[%s3356_s8 + $0x8] sm:$0xff]  }
0x122f   :  { %2425 = vmatpush3.bf16.msra.mxu0 %v2516_v43 }
0x1230   :  { %2558 = vpow2.f32 %v2261_v3  ;;  %v1155_v35 = vrot.slane %v1148_v30, %v3061_v15  ;;  %2426 = vmatprep.subr.bf16.mxu0 %v2643_v27 }
0x1233   :  { %2427 = vmatpush3.bf16.msra.mxu0 %v2517_v33 }
0x1234   :  { %2440 = vmatprep.subr.bf16.mxu0 %v2643_v27 }
0x123a   :  { %v2559_v4 = vpop.eup %2558 }
0x123b   :  { %v1212_v5 = vadd.f32 1.0, %v2559_v4 }
0x123d   :  { %2560 = vrcp.f32 %v1212_v5 }
0x1247   :  { %v2561_v36 = vpop.eup %2560 }
0x1248   :  { %v1227_v41 = vsub.f32 1.0, %v2561_v36  ;;  %v1233_v47 = vmul.f32 %v2561_v36, %v1139_v22 }
0x12a0   :  { %v1218_v6 = vpop.permute.xlu0 %1217 }
0x12a1   :  { %v1220_v37 = vmul.f32 %v2561_v36, %v1218_v6 }
0x12a3   :  { %1222 = vrot.lane.b32.xlu1 %v1220_v37, %s2649_s19 }
0x1315   :  { %v1223_v38 = vpop.permute.xlu1 %1222 }
0x1316   :  { %v1225_v39 = vadd.f32 %v1223_v38, %v1162_v32 }
0x1318   :  { %2562 = vtanh.f32 %v1225_v39 }
0x1322   :  { %v2563_v40 = vpop.eup %2562 }
0x1323   :  { %1229 = vrot.lane.b32.xlu0 %v2563_v40, %s2651_s5 }
0x1395   :  { %v1230_v42 = vpop.permute.xlu0 %1229 }
0x1396   :  { %v1232_v29 = vmul.f32 %v1230_v42, %v1227_v41  ;;  %v2273_v41 = vld [vmem:[%s3359_s11] ss:$0 sm:$0xff] }
0x1398   :  { %v3050_v49 = vadd.f32 %v1233_v47, %v1232_v29 }
0x139a   :  { %v1235_v50 = vpack.c.bf16 %v3050_v49, %v3050_v49 }
0x139c   :  { %1258 = vrot.lane.b32.xlu1 %v1235_v50, %s2651_s5  ;;  %v1243_v23 = vrot.slane %v1235_v50, %v3061_v15 }
0x139e   :  { %v1250_v28 = vrot.slane %v1243_v23, %v3061_v15  ;;  %v2264_v23 = vld [vmem:[%s3357_s9] ss:$0 sm:$0xff] }
0x140e   :  { %v1259_v51 = vpop.permute.xlu1 %1258 }
0x140f   :  { %2421 = vmatmul.mubr.msk.bf16.vlgmr.msra.gmra.mrb[16].mxu1 %vm582_vm2, %v1259_v51 }
0x1410   :  { %2436 = vmatprep.mubr.msk.bf16.mxu1 %vm2644_vm1, %v2643_v27  ;;  %2433 = vmatpush3.bf16.msra.mxu1 %v3087_v57 }
0x1411   :  { %2434 = vmatprep.subr.bf16.mxu1 %v2643_v27 }
0x1414   :  { %2435 = vmatpush3.bf16.msra.mxu1 %v3094_v58 }
0x1415   :  { %2448 = vmatprep.subr.bf16.mxu1 %v2643_v27 }
0x1417   :  { %2437 = vmatmul.mubr.msk.bf16.vlgmr.msra.gmra.mrb[20].mxu1 %vm582_vm2, %v1549_v45 }
0x1418   :  { %2449 = vmatpush3.bf16.msra.mxu1 %v3087_v57  ;;  %2452 = vmatprep.mubr.msk.bf16.mxu1 %vm2644_vm1, %v2643_v27 }
0x1419   :  { %2450 = vmatprep.subr.bf16.mxu1 %v2643_v27 }
0x141c   :  { %2451 = vmatpush3.bf16.msra.mxu1 %v3094_v58 }
0x141d   :  { %2464 = vmatprep.subr.bf16.mxu1 %v2643_v27 }
0x14e2   :  { %v1297_v52 = vpop.f32.mrb[16].mxu1 }
0x14e3   :  { %v1310_v53 = vadd.f32 %v1297_v52, %v2930_v25  ;;  %v2422_v54 = vpop.f32.mrb[17].mxu1  ;;  %v1303_v62 = vadd.f32 %v1297_v52, %v1257_v61 }
0x14e4   :  { %v1300_v59 = vpop.f32.mrb[18].mxu1 }
0x14e5   :  { %1312 = vrot.lane.b32.xlu0 %v1310_v53, %s2649_s19  ;;  %v2423_v60 = vpop.f32.mrb[19].mxu1  ;;  %v2263_v63 = vmul.f32 -1.442695, %v1303_v62 }
0x14e7   :  { %2564 = vpow2.f32 %v2263_v63 }
0x14ea   :  { %v1599_v42 = vpop.f32.mrb[20].mxu1 }
0x14eb   :  { %v2438_v47 = vpop.f32.mrb[21].mxu1 }
0x14ec   :  { %v1602_v29 = vpop.f32.mrb[22].mxu1 }
0x14f1   :  { %v2565_v1 = vpop.eup %2564 }
0x14f2   :  { %v1307_v2 = vadd.f32 1.0, %v2565_v1 }
0x14f4   :  { %2566 = vrcp.f32 %v1307_v2 }
0x14fe   :  { %v2567_v8 = vpop.eup %2566 }
0x14ff   :  { %v1322_v31 = vsub.f32 1.0, %v2567_v8  ;;  %v1328_v3 = vmul.f32 %v2567_v8, %v3050_v49  ;;  %v2439_v49 = vpop.f32.mrb[23].mxu1 }
0x1557   :  { %v1313_v25 = vpop.permute.xlu0 %1312 }
0x1558   :  { %v1315_v9 = vmul.f32 %v2567_v8, %v1313_v25 }
0x155a   :  { %1317 = vrot.lane.b32.xlu1 %v1315_v9, %s2649_s19 }
0x155e   :  { %681 = vrot.lane.b32.xlu1 %v680_v11, %s2651_s5 }
0x1562   :  { %871 = vrot.lane.b32.xlu1 %v870_v18, %s2651_s5 }
0x1566   :  { %1061 = vrot.lane.b32.xlu1 %v1060_v19, %s2651_s5 }
0x156a   :  { %1251 = vrot.lane.b32.xlu1 %v1250_v28, %s2651_s5 }
0x156e   :  { %1617 = vrot.lane.b32.xlu1 %v2273_v41, %s2649_s19 }
0x15cc   :  { %v1318_v16 = vpop.permute.xlu1 %1317 }
0x15cd   :  { %v1320_v20 = vadd.f32 %v1318_v16, %v1257_v61 }
0x15cf   :  { %2568 = vtanh.f32 %v1320_v20 }
0x15d0   :  { %v682_v55 = vpop.permute.xlu1 %681 }
0x15d1   :  { %685 = vst.msk [vmem:[#allocation3] sm:$0x1] %vm684_vm5, %v682_v55 }
0x15d4   :  { %v872_v0 = vpop.permute.xlu1 %871 }
0x15d5   :  { %875 = vst.msk [vmem:[#allocation3 + $0x2] sm:$0x1] %vm684_vm5, %v872_v0 }
0x15d8   :  { %v1062_v21 = vpop.permute.xlu1 %1061  ;;  %v1357_v59 = vld [vmem:[#allocation3] sm:$0x1] }
0x15d9   :  { %v2569_v34 = vpop.eup %2568  ;;  %1065 = vst.msk [vmem:[#allocation3 + $0x4] sm:$0x1] %vm684_vm5, %v1062_v21 }
0x15da   :  { %1324 = vrot.lane.b32.xlu0 %v2569_v34, %s2651_s5 }
0x15dc   :  { %v1252_v22 = vpop.permute.xlu1 %1251  ;;  %v1359_v53 = vld [vmem:[#allocation3 + $0x2] sm:$0x1] }
0x15dd   :  { %1255 = vst.msk [vmem:[#allocation3 + $0x6] sm:$0x1] %vm684_vm5, %v1252_v22 }
0x15de   :  { %776 = vrot.lane.b32.xlu0 %v775_v24, %s2651_s5 }
0x15e0   :  { %v1361_v62 = vld [vmem:[#allocation3 + $0x4] sm:$0x1]  ;;  %v3148_v63 = vpop.permute.xlu1 %1617 }
0x15e1   :  { %v1620_v10 = vadd.f32 %v3148_v63, %v1599_v42 }
0x15e2   :  { %966 = vrot.lane.b32.xlu0 %v965_v46, %s2651_s5 }
0x15e4   :  { %v1363_v13 = vld [vmem:[#allocation3 + $0x6] sm:$0x1] }
0x15e6   :  { %1156 = vrot.lane.b32.xlu0 %v1155_v35, %s2651_s5 }
0x164c   :  { %v1325_v32 = vpop.permute.xlu0 %1324 }
0x164d   :  { %v1327_v4 = vmul.f32 %v1325_v32, %v1322_v31 }
0x164f   :  { %v3132_v5 = vadd.f32 %v1328_v3, %v1327_v4 }
0x1650   :  { %v777_v36 = vpop.permute.xlu0 %776 }
0x1651   :  { %v1330_v6 = vpack.c.bf16 %v3132_v5, %v3132_v5  ;;  %780 = vst.msk [vmem:[#allocation3 + $0x1] sm:$0x1] %vm684_vm5, %v777_v36 }
0x1653   :  { %v1338_v37 = vrot.slane %v1330_v6, %v3061_v15 }
0x1654   :  { %v967_v38 = vpop.permute.xlu0 %966 }
0x1655   :  { %970 = vst.msk [vmem:[#allocation3 + $0x3] sm:$0x1] %vm684_vm5, %v967_v38  ;;  %v1345_v39 = vrot.slane %v1338_v37, %v3061_v15 }
0x1657   :  { %1346 = vrot.lane.b32.xlu0 %v1345_v39, %s2651_s5 }
0x1658   :  { %v1157_v40 = vpop.permute.xlu0 %1156  ;;  %v1358_v52 = vld [vmem:[#allocation3 + $0x1] sm:$0x1] }
0x1659   :  { %1160 = vst.msk [vmem:[#allocation3 + $0x5] sm:$0x1] %vm684_vm5, %v1157_v40  ;;  %v1384_v61 = vcombine.low %v1357_v59, %v1358_v52 }
0x165b   :  { %v1394_v25 = vrot.slane %v1384_v61, %v3061_v15  ;;  %1622 = vrot.lane.b32.xlu0 %v1620_v10, %s2649_s19 }
0x165c   :  { %v1360_v51 = vld [vmem:[#allocation3 + $0x3] sm:$0x1] }
0x165d   :  { %v1385_v54 = vcombine.low %v1359_v53, %v1360_v51 }
0x165f   :  { %v1401_v2 = vrot.slane %v1385_v54, %v3061_v15 }
0x1660   :  { %v1362_v60 = vld [vmem:[#allocation3 + $0x5] sm:$0x1] }
0x1661   :  { %v1386_v1 = vcombine.low %v1361_v62, %v1362_v60  ;;  %v1416_v11 = vcombine.low %v1394_v25, %v1401_v2 }
0x1663   :  { %v1408_v9 = vrot.slane %v1386_v1, %v3061_v15  ;;  %v1424_v18 = vrot.slane %v1416_v11, %v3061_v15 }
0x16c9   :  { %v1347_v50 = vpop.permute.xlu0 %1346 }
0x16ca   :  { %1350 = vst.msk [vmem:[#allocation3 + $0x7] sm:$0x1] %vm684_vm5, %v1347_v50 }
0x16d1   :  { %v1364_v14 = vld [vmem:[#allocation3 + $0x7] sm:$0x1] }
0x16d2   :  { %v1387_v8 = vcombine.low %v1363_v13, %v1364_v14 }
0x16d4   :  { %v1415_v26 = vrot.slane %v1387_v8, %v3061_v15 }
0x16d6   :  { %v1417_v12 = vcombine.low %v1408_v9, %v1415_v26 }
0x16d8   :  { %v1431_v7 = vrot.slane %v1417_v12, %v3061_v15 }
0x16da   :  { %v1432_v19 = vcombine.low %v1424_v18, %v1431_v7 }
0x16dc   :  { %2429 = vmatmul.mubr.msk.bf16.vlgmr.msra.gmra.mrb[16].mxu0 %vm582_vm2, %v1432_v19 }
0x16dd   :  { %2441 = vmatpush3.bf16.msra.mxu0 %v3087_v57  ;;  %2444 = vmatprep.mubr.msk.bf16.mxu0 %vm2644_vm1, %v2643_v27 }
0x16de   :  { %2442 = vmatprep.subr.bf16.mxu0 %v2643_v27 }
0x16e1   :  { %2443 = vmatpush3.bf16.msra.mxu0 %v3094_v58 }
0x16e2   :  { %2456 = vmatprep.subr.bf16.mxu0 %v2643_v27 }
0x17af   :  { %v1482_v28 = vpop.f32.mrb[16].mxu0 }
0x17b0   :  { %v1483_v15 = vadd.f32 %v2264_v23, %v1482_v28  ;;  %v2430_v16 = vpop.f32.mrb[17].mxu0 }
0x17b1   :  { %v1485_v20 = vpop.f32.mrb[18].mxu0 }
0x17b2   :  { %v1491_v55 = vcombine.high %v1483_v15, %v1483_v15  ;;  %v1498_v0 = vrot.slane %v1483_v15, %v2776_v17  ;;  %v1486_v21 = vadd.f32 %v2264_v23, %v1485_v20  ;;  %v2431_v56 = vpop.f32.mrb[19].mxu0 }
0x17b4   :  { %v1505_v34 = vrot.slane %v1491_v55, %v2776_v17  ;;  %v1506_v22 = vcombine.high %v1498_v0, %v1498_v0  ;;  %1533 = vst.msk [vmem:[#allocation2] sm:$0x3] %vm553_vm4, %v1498_v0  ;;  %v1508_v24 = vcombine.high %v1486_v21, %v1486_v21  ;;  %v1515_v44 = vrot.slane %v1486_v21, %v2776_v17 }
0x17b6   :  { %v1507_v45 = vcombine.high %v1505_v34, %v1505_v34  ;;  %1534 = vst.msk [vmem:[#allocation2 + $0x2] sm:$0x3] %vm553_vm4, %v1506_v22  ;;  %1535 = vst.msk [vmem:[#allocation2 + $0x4] sm:$0x3] %vm553_vm4, %v1505_v34  ;;  %v1522_v46 = vrot.slane %v1508_v24, %v2776_v17  ;;  %v1523_v30 = vcombine.high %v1515_v44, %v1515_v44  ;;  %v1623_v17 = vpop.permute.xlu0 %1622 }
0x17b7   :  { %1537 = vst.msk [vmem:[#allocation2 + $0x8] sm:$0x3] %vm553_vm4, %v1515_v44 }
0x17b8   :  { %1536 = vst.msk [vmem:[#allocation2 + $0x6] sm:$0x3] %vm553_vm4, %v1507_v45  ;;  %v1524_v35 = vcombine.high %v1522_v46, %v1522_v46  ;;  %1538 = vst.msk [vmem:[#allocation2 + $0xa] sm:$0x3] %vm553_vm4, %v1523_v30 }
0x17b9   :  { %1539 = vst.msk [vmem:[#allocation2 + $0xc] sm:$0x3] %vm553_vm4, %v1522_v46 }
0x17ba   :  { %1540 = vst.msk [vmem:[#allocation2 + $0xe] sm:$0x3] %vm553_vm4, %v1524_v35 }
0x17bb   :  { %v1548_v43 = vld [vmem:[#allocation2] sm:$0x3] }
0x17bc   :  { %v1605_v31 = vadd.f32 %v1599_v42, %v1548_v43 }
0x17bd   :  { %v1649_v59 = vld [vmem:[#allocation2 + $0x2] sm:$0x3]  ;;  %v1730_v55 = vld [vmem:[#allocation2 + $0x4] sm:$0x3] }
0x17be   :  { %v2272_v32 = vmul.f32 -1.442695, %v1605_v31 }
0x17c0   :  { %2570 = vpow2.f32 %v2272_v32 }
0x17ca   :  { %v2571_v33 = vpop.eup %2570 }
0x17cb   :  { %v1609_v3 = vadd.f32 1.0, %v2571_v33 }
0x17cd   :  { %2572 = vrcp.f32 %v1609_v3 }
0x17d7   :  { %v2573_v4 = vpop.eup %2572 }
0x17d8   :  { %v1625_v36 = vmul.f32 %v2573_v4, %v1623_v17  ;;  %v1632_v40 = vsub.f32 1.0, %v2573_v4 }
0x17da   :  { %1627 = vrot.lane.b32.xlu1 %v1625_v36, %s2649_s19 }
0x17de   :  { %1639 = vrot.lane.b32.xlu1 %v3099_v48, %s2650_s20 }
0x184c   :  { %v1628_v6 = vpop.permute.xlu1 %1627 }
0x184d   :  { %v1630_v37 = vadd.f32 %v1628_v6, %v1548_v43 }
0x184f   :  { %2574 = vtanh.f32 %v1630_v37 }
0x1850   :  { %v1640_v39 = vpop.permute.xlu1 %1639 }
0x1851   :  { %v1642_v42 = vmul.f32 %v2573_v4, %v1640_v39  ;;  %v1811_v39 = vld [vmem:[#allocation2 + $0x6] sm:$0x3] }
0x1859   :  { %v2575_v38 = vpop.eup %2574 }
0x185a   :  { %1634 = vrot.lane.b32.xlu0 %v2575_v38, %s2651_s5 }
0x18cc   :  { %v1635_v41 = vpop.permute.xlu0 %1634 }
0x18cd   :  { %v1637_v47 = vmul.f32 %v1635_v41, %v1632_v40 }
0x18cf   :  { %v3184_v29 = vadd.f32 %v1642_v42, %v1637_v47 }
0x18d1   :  { %v1650_v49 = vpack.c.bf16 %v3184_v29, %v3184_v29 }
0x18d3   :  { %1652 = vrot.lane.b32.xlu0 %v1650_v49, %s2651_s5 }
0x1945   :  { %v1653_v50 = vpop.permute.xlu0 %1652 }
0x1946   :  { %2445 = vmatmul.mubr.msk.bf16.vlgmr.msra.gmra.mrb[20].mxu0 %vm582_vm2, %v1653_v50 }
0x1947   :  { %2457 = vmatpush3.bf16.msra.mxu0 %v3087_v57  ;;  %2460 = vmatprep.mubr.msk.bf16.mxu0 %vm2644_vm1, %v2643_v27 }
0x1948   :  { %2458 = vmatprep.subr.bf16.mxu0 %v2643_v27 }
0x194b   :  { %2459 = vmatpush3.bf16.msra.mxu0 %v3094_v58 }
0x194c   :  { %2472 = vmatprep.subr.bf16.mxu0 %v2643_v27 }
0x1a19   :  { %v1691_v48 = vpop.f32.mrb[20].mxu0 }
0x1a1a   :  { %v1704_v51 = vadd.f32 %v1691_v48, %v3148_v63  ;;  %v2446_v52 = vpop.f32.mrb[21].mxu0  ;;  %v1697_v60 = vadd.f32 %v1691_v48, %v1649_v59 }
0x1a1b   :  { %v1694_v53 = vpop.f32.mrb[22].mxu0 }
0x1a1c   :  { %1706 = vrot.lane.b32.xlu1 %v1704_v51, %s2649_s19  ;;  %v2447_v54 = vpop.f32.mrb[23].mxu0  ;;  %v2275_v61 = vmul.f32 -1.442695, %v1697_v60 }
0x1a1e   :  { %2576 = vpow2.f32 %v2275_v61 }
0x1a28   :  { %v2577_v62 = vpop.eup %2576 }
0x1a29   :  { %v1701_v1 = vadd.f32 1.0, %v2577_v62 }
0x1a2b   :  { %2578 = vrcp.f32 %v1701_v1 }
0x1a35   :  { %v2579_v2 = vpop.eup %2578 }
0x1a36   :  { %v1716_v9 = vsub.f32 1.0, %v2579_v2  ;;  %v1722_v11 = vmul.f32 %v2579_v2, %v3184_v29 }
0x1a8e   :  { %v1707_v10 = vpop.permute.xlu1 %1706 }
0x1a8f   :  { %v1709_v13 = vmul.f32 %v2579_v2, %v1707_v10 }
0x1a91   :  { %1711 = vrot.lane.b32.xlu0 %v1709_v13, %s2649_s19 }
0x1b03   :  { %v1712_v14 = vpop.permute.xlu0 %1711 }
0x1b04   :  { %v1714_v8 = vadd.f32 %v1712_v14, %v1649_v59 }
0x1b06   :  { %2580 = vtanh.f32 %v1714_v8 }
0x1b10   :  { %v2581_v25 = vpop.eup %2580 }
0x1b11   :  { %1718 = vrot.lane.b32.xlu1 %v2581_v25, %s2651_s5 }
0x1b83   :  { %v1719_v26 = vpop.permute.xlu1 %1718 }
0x1b84   :  { %v1721_v12 = vmul.f32 %v1719_v26, %v1716_v9  ;;  %v1892_v9 = vld [vmem:[#allocation2 + $0x8] sm:$0x3] }
0x1b86   :  { %v3201_v18 = vadd.f32 %v1722_v11, %v1721_v12 }
0x1b88   :  { %v1731_v7 = vpack.c.bf16 %v3201_v18, %v3201_v18 }
0x1b8a   :  { %1733 = vrot.lane.b32.xlu0 %v1731_v7, %s2651_s5 }
0x1bfc   :  { %v1734_v19 = vpop.permute.xlu0 %1733 }
0x1bfd   :  { %2453 = vmatmul.mubr.msk.bf16.vlgmr.msra.gmra.mrb[24].mxu1 %vm582_vm2, %v1734_v19 }
0x1bfe   :  { %2465 = vmatpush3.bf16.msra.mxu1 %v3087_v57  ;;  %2468 = vmatprep.mubr.msk.bf16.mxu1 %vm2644_vm1, %v2643_v27 }
0x1bff   :  { %2466 = vmatprep.subr.bf16.mxu1 %v2643_v27 }
0x1c02   :  { %2467 = vmatpush3.bf16.msra.mxu1 %v3094_v58 }
0x1c03   :  { %2480 = vmatprep.subr.bf16.mxu1 %v2643_v27 }
0x1cd0   :  { %v1772_v23 = vpop.f32.mrb[24].mxu1 }
0x1cd1   :  { %v1785_v28 = vadd.f32 %v1772_v23, %v3148_v63  ;;  %v2454_v15 = vpop.f32.mrb[25].mxu1  ;;  %v1778_v0 = vadd.f32 %v1772_v23, %v1730_v55 }
0x1cd2   :  { %v1775_v16 = vpop.f32.mrb[26].mxu1 }
0x1cd3   :  { %1787 = vrot.lane.b32.xlu1 %v1785_v28, %s2649_s19  ;;  %v2455_v20 = vpop.f32.mrb[27].mxu1  ;;  %v2278_v21 = vmul.f32 -1.442695, %v1778_v0 }
0x1cd5   :  { %2582 = vpow2.f32 %v2278_v21 }
0x1cdf   :  { %v2583_v56 = vpop.eup %2582 }
0x1ce0   :  { %v1782_v34 = vadd.f32 1.0, %v2583_v56 }
0x1ce2   :  { %2584 = vrcp.f32 %v1782_v34 }
0x1cec   :  { %v2585_v22 = vpop.eup %2584 }
0x1ced   :  { %v1797_v35 = vsub.f32 1.0, %v2585_v22  ;;  %v1803_v31 = vmul.f32 %v2585_v22, %v3201_v18 }
0x1d45   :  { %v1788_v24 = vpop.permute.xlu1 %1787 }
0x1d46   :  { %v1790_v44 = vmul.f32 %v2585_v22, %v1788_v24 }
0x1d48   :  { %1792 = vrot.lane.b32.xlu0 %v1790_v44, %s2649_s19 }
0x1dba   :  { %v1793_v45 = vpop.permute.xlu0 %1792 }
0x1dbb   :  { %v1795_v46 = vadd.f32 %v1793_v45, %v1730_v55 }
0x1dbd   :  { %2586 = vtanh.f32 %v1795_v46 }
0x1dc7   :  { %v2587_v30 = vpop.eup %2586 }
0x1dc8   :  { %1799 = vrot.lane.b32.xlu1 %v2587_v30, %s2651_s5 }
0x1e3a   :  { %v1800_v43 = vpop.permute.xlu1 %1799 }
0x1e3b   :  { %v1802_v32 = vmul.f32 %v1800_v43, %v1797_v35  ;;  %v1973_v43 = vld [vmem:[#allocation2 + $0xa] sm:$0x3] }
0x1e3d   :  { %v3218_v33 = vadd.f32 %v1803_v31, %v1802_v32 }
0x1e3f   :  { %v1812_v3 = vpack.c.bf16 %v3218_v33, %v3218_v33 }
0x1e41   :  { %1814 = vrot.lane.b32.xlu0 %v1812_v3, %s2651_s5 }
0x1eb3   :  { %v1815_v17 = vpop.permute.xlu0 %1814 }
0x1eb4   :  { %2461 = vmatmul.mubr.msk.bf16.vlgmr.msra.gmra.mrb[24].mxu0 %vm582_vm2, %v1815_v17 }
0x1eb5   :  { %2473 = vmatpush3.bf16.msra.mxu0 %v3087_v57  ;;  %2476 = vmatprep.mubr.msk.bf16.mxu0 %vm2644_vm1, %v2643_v27 }
0x1eb6   :  { %2474 = vmatprep.subr.bf16.mxu0 %v2643_v27 }
0x1eb9   :  { %2475 = vmatpush3.bf16.msra.mxu0 %v3094_v58 }
0x1eba   :  { %2488 = vmatprep.subr.bf16.mxu0 %v2643_v27 }
0x1f87   :  { %v1853_v4 = vpop.f32.mrb[24].mxu0 }
0x1f88   :  { %v1866_v36 = vadd.f32 %v1853_v4, %v3148_v63  ;;  %v2462_v6 = vpop.f32.mrb[25].mxu0  ;;  %v1859_v40 = vadd.f32 %v1853_v4, %v1811_v39 }
0x1f89   :  { %v1856_v37 = vpop.f32.mrb[26].mxu0 }
0x1f8a   :  { %1868 = vrot.lane.b32.xlu1 %v1866_v36, %s2649_s19  ;;  %v2463_v38 = vpop.f32.mrb[27].mxu0  ;;  %v2281_v41 = vmul.f32 -1.442695, %v1859_v40 }
0x1f8c   :  { %2588 = vpow2.f32 %v2281_v41 }
0x1f96   :  { %v2589_v42 = vpop.eup %2588 }
0x1f97   :  { %v1863_v47 = vadd.f32 1.0, %v2589_v42 }
0x1f99   :  { %2590 = vrcp.f32 %v1863_v47 }
0x1fa3   :  { %v2591_v49 = vpop.eup %2590 }
0x1fa4   :  { %v1878_v54 = vsub.f32 1.0, %v2591_v49  ;;  %v1884_v60 = vmul.f32 %v2591_v49, %v3218_v33 }
0x1ffc   :  { %v1869_v50 = vpop.permute.xlu1 %1868 }
0x1ffd   :  { %v1871_v48 = vmul.f32 %v2591_v49, %v1869_v50 }
0x1fff   :  { %1873 = vrot.lane.b32.xlu0 %v1871_v48, %s2649_s19 }
0x2071   :  { %v1874_v51 = vpop.permute.xlu0 %1873 }
0x2072   :  { %v1876_v52 = vadd.f32 %v1874_v51, %v1811_v39 }
0x2074   :  { %2592 = vtanh.f32 %v1876_v52 }
0x207e   :  { %v2593_v53 = vpop.eup %2592 }
0x207f   :  { %1880 = vrot.lane.b32.xlu1 %v2593_v53, %s2651_s5  ;;  %v2054_v53 = vld [vmem:[#allocation2 + $0xc] sm:$0x3] }
0x20f1   :  { %v1881_v59 = vpop.permute.xlu1 %1880 }
0x20f2   :  { %v1883_v61 = vmul.f32 %v1881_v59, %v1878_v54 }
0x20f4   :  { %v3235_v62 = vadd.f32 %v1884_v60, %v1883_v61 }
0x20f6   :  { %v1893_v1 = vpack.c.bf16 %v3235_v62, %v3235_v62 }
0x20f8   :  { %1895 = vrot.lane.b32.xlu0 %v1893_v1, %s2651_s5 }
0x216a   :  { %v1896_v2 = vpop.permute.xlu0 %1895 }
0x216b   :  { %2469 = vmatmul.mubr.msk.bf16.vlgmr.msra.gmra.mrb[28].mxu1 %vm582_vm2, %v1896_v2 }
0x216c   :  { %2481 = vmatpush3.bf16.msra.mxu1 %v3087_v57  ;;  %2484 = vmatprep.mubr.msk.bf16.mxu1 %vm2644_vm1, %v2643_v27 }
0x216d   :  { %2482 = vmatprep.subr.bf16.mxu1 %v2643_v27 }
0x2170   :  { %2483 = vmatpush3.bf16.msra.mxu1 %v3094_v58 }
0x223e   :  { %v1934_v10 = vpop.f32.mrb[28].mxu1 }
0x223f   :  { %v1947_v13 = vadd.f32 %v1934_v10, %v3148_v63  ;;  %v2470_v14 = vpop.f32.mrb[29].mxu1  ;;  %v1940_v26 = vadd.f32 %v1934_v10, %v1892_v9 }
0x2240   :  { %v1937_v8 = vpop.f32.mrb[30].mxu1 }
0x2241   :  { %1949 = vrot.lane.b32.xlu1 %v1947_v13, %s2649_s19  ;;  %v2471_v25 = vpop.f32.mrb[31].mxu1  ;;  %v2284_v11 = vmul.f32 -1.442695, %v1940_v26 }
0x2243   :  { %2594 = vpow2.f32 %v2284_v11 }
0x224d   :  { %v2595_v12 = vpop.eup %2594 }
0x224e   :  { %v1944_v7 = vadd.f32 1.0, %v2595_v12 }
0x2250   :  { %2596 = vrcp.f32 %v1944_v7 }
0x225a   :  { %v2597_v19 = vpop.eup %2596 }
0x225b   :  { %v1959_v55 = vsub.f32 1.0, %v2597_v19  ;;  %v1965_v21 = vmul.f32 %v2597_v19, %v3235_v62 }
0x22b3   :  { %v1950_v23 = vpop.permute.xlu1 %1949 }
0x22b4   :  { %v1952_v28 = vmul.f32 %v2597_v19, %v1950_v23 }
0x22b6   :  { %1954 = vrot.lane.b32.xlu0 %v1952_v28, %s2649_s19 }
0x2328   :  { %v1955_v15 = vpop.permute.xlu0 %1954 }
0x2329   :  { %v1957_v16 = vadd.f32 %v1955_v15, %v1892_v9 }
0x232b   :  { %2598 = vtanh.f32 %v1957_v16 }
0x2335   :  { %v2599_v20 = vpop.eup %2598 }
0x2336   :  { %1961 = vrot.lane.b32.xlu1 %v2599_v20, %s2651_s5 }
0x23a8   :  { %v1962_v0 = vpop.permute.xlu1 %1961 }
0x23a9   :  { %v1964_v56 = vmul.f32 %v1962_v0, %v1959_v55  ;;  %v2135_v55 = vld [vmem:[#allocation2 + $0xe] sm:$0x3] }
0x23ab   :  { %v3251_v34 = vadd.f32 %v1965_v21, %v1964_v56 }
0x23ad   :  { %v1974_v22 = vpack.c.bf16 %v3251_v34, %v3251_v34 }
0x23af   :  { %1976 = vrot.lane.b32.xlu0 %v1974_v22, %s2651_s5 }
0x2421   :  { %v1977_v24 = vpop.permute.xlu0 %1976 }
0x2422   :  { %2477 = vmatmul.mubr.msk.bf16.vlgmr.msra.gmra.mrb[28].mxu0 %vm582_vm2, %v1977_v24 }
0x2423   :  { %2489 = vmatpush3.bf16.msra.mxu0 %v3087_v57  ;;  %2492 = vmatprep.mubr.msk.bf16.mxu0 %vm2644_vm1, %v2643_v27 }
0x2424   :  { %2490 = vmatprep.subr.bf16.mxu0 %v2643_v27 }
0x2427   :  { %2491 = vmatpush3.bf16.msra.mxu0 %v3094_v58 }
0x24f5   :  { %v2015_v44 = vpop.f32.mrb[28].mxu0 }
0x24f6   :  { %v2028_v45 = vadd.f32 %v2015_v44, %v3148_v63  ;;  %v2478_v46 = vpop.f32.mrb[29].mxu0  ;;  %v2021_v31 = vadd.f32 %v2015_v44, %v1973_v43 }
0x24f7   :  { %v2018_v30 = vpop.f32.mrb[30].mxu0 }
0x24f8   :  { %2030 = vrot.lane.b32.xlu1 %v2028_v45, %s2649_s19  ;;  %v2479_v35 = vpop.f32.mrb[31].mxu0  ;;  %v2287_v32 = vmul.f32 -1.442695, %v2021_v31 }
0x24fa   :  { %2600 = vpow2.f32 %v2287_v32 }
0x2504   :  { %v2601_v57 = vpop.eup %2600 }
0x2505   :  { %v2025_v3 = vadd.f32 1.0, %v2601_v57 }
0x2507   :  { %2602 = vrcp.f32 %v2025_v3 }
0x2511   :  { %v2603_v17 = vpop.eup %2602 }
0x2512   :  { %v2040_v37 = vsub.f32 1.0, %v2603_v17  ;;  %v2046_v39 = vmul.f32 %v2603_v17, %v3251_v34 }
0x256a   :  { %v2031_v4 = vpop.permute.xlu1 %2030 }
0x256b   :  { %v2033_v27 = vmul.f32 %v2603_v17, %v2031_v4 }
0x256d   :  { %2035 = vrot.lane.b32.xlu0 %v2033_v27, %s2649_s19 }
0x25df   :  { %v2036_v58 = vpop.permute.xlu0 %2035 }
0x25e0   :  { %v2038_v36 = vadd.f32 %v2036_v58, %v1973_v43 }
0x25e2   :  { %2604 = vtanh.f32 %v2038_v36 }
0x25ec   :  { %v2605_v6 = vpop.eup %2604 }
0x25ed   :  { %2042 = vrot.lane.b32.xlu1 %v2605_v6, %s2651_s5 }
0x265f   :  { %v2043_v38 = vpop.permute.xlu1 %2042 }
0x2660   :  { %v2045_v40 = vmul.f32 %v2043_v38, %v2040_v37 }
0x2662   :  { %v3267_v41 = vadd.f32 %v2046_v39, %v2045_v40 }
0x2664   :  { %v2055_v42 = vpack.c.bf16 %v3267_v41, %v3267_v41 }
0x2666   :  { %2057 = vrot.lane.b32.xlu0 %v2055_v42, %s2651_s5 }
0x26d8   :  { %v2058_v47 = vpop.permute.xlu0 %2057 }
0x26d9   :  { %2485 = vmatmul.mubr.msk.bf16.vlgmr.msra.gmra.mrb[32].mxu1 %vm582_vm2, %v2058_v47 }
0x27ac   :  { %v2096_v49 = vpop.f32.mrb[32].mxu1 }
0x27ad   :  { %v2109_v50 = vadd.f32 %v2096_v49, %v3148_v63  ;;  %v2486_v48 = vpop.f32.mrb[33].mxu1  ;;  %v2102_v54 = vadd.f32 %v2096_v49, %v2054_v53 }
0x27ae   :  { %v2099_v51 = vpop.f32.mrb[34].mxu1 }
0x27af   :  { %2111 = vrot.lane.b32.xlu1 %v2109_v50, %s2649_s19  ;;  %v2487_v52 = vpop.f32.mrb[35].mxu1  ;;  %v2290_v59 = vmul.f32 -1.442695, %v2102_v54 }
0x27b1   :  { %2606 = vpow2.f32 %v2290_v59 }
0x27bb   :  { %v2607_v60 = vpop.eup %2606 }
0x27bc   :  { %v2106_v61 = vadd.f32 1.0, %v2607_v60 }
0x27be   :  { %2608 = vrcp.f32 %v2106_v61 }
0x27c8   :  { %v2609_v1 = vpop.eup %2608 }
0x27c9   :  { %v2121_v25 = vsub.f32 1.0, %v2609_v1  ;;  %v2127_v26 = vmul.f32 %v2609_v1, %v3267_v41 }
0x2821   :  { %v2112_v2 = vpop.permute.xlu1 %2111 }
0x2822   :  { %v2114_v10 = vmul.f32 %v2609_v1, %v2112_v2 }
0x2824   :  { %2116 = vrot.lane.b32.xlu0 %v2114_v10, %s2649_s19 }
0x2896   :  { %v2117_v13 = vpop.permute.xlu0 %2116 }
0x2897   :  { %v2119_v14 = vadd.f32 %v2117_v13, %v2054_v53 }
0x2899   :  { %2610 = vtanh.f32 %v2119_v14 }
0x28a3   :  { %v2611_v8 = vpop.eup %2610 }
0x28a4   :  { %2123 = vrot.lane.b32.xlu1 %v2611_v8, %s2651_s5 }
0x2916   :  { %v2124_v9 = vpop.permute.xlu1 %2123 }
0x2917   :  { %v2126_v11 = vmul.f32 %v2124_v9, %v2121_v25 }
0x2919   :  { %v2128_v12 = vadd.f32 %v2127_v26, %v2126_v11 }
0x291b   :  { %v2136_v7 = vpack.c.bf16 %v2128_v12, %v2128_v12 }
0x291d   :  { %2138 = vrot.lane.b32.xlu0 %v2136_v7, %s2651_s5 }
0x298f   :  { %v2139_v19 = vpop.permute.xlu0 %2138 }
0x2990   :  { %2493 = vmatmul.mubr.msk.bf16.vlgmr.msra.gmra.mrb[32].mxu0 %vm582_vm2, %v2139_v19 }
0x2a63   :  { %v2177_v23 = vpop.f32.mrb[32].mxu0 }
0x2a64   :  { %v2190_v28 = vadd.f32 %v2177_v23, %v3148_v63  ;;  %v2494_v15 = vpop.f32.mrb[33].mxu0  ;;  %v2183_v0 = vadd.f32 %v2177_v23, %v2135_v55 }
0x2a65   :  { %v2180_v16 = vpop.f32.mrb[34].mxu0 }
0x2a66   :  { %2192 = vrot.lane.b32.xlu1 %v2190_v28, %s2649_s19  ;;  %v2495_v20 = vpop.f32.mrb[35].mxu0  ;;  %v2293_v21 = vmul.f32 -1.442695, %v2183_v0 }
0x2a68   :  { %2612 = vpow2.f32 %v2293_v21 }
0x2a72   :  { %v2613_v56 = vpop.eup %2612 }
0x2a73   :  { %v2187_v22 = vadd.f32 1.0, %v2613_v56 }
0x2a75   :  { %2614 = vrcp.f32 %v2187_v22 }
0x2a7f   :  { %v2615_v24 = vpop.eup %2614 }
0x2a80   :  { %v2202_v43 = vsub.f32 1.0, %v2615_v24  ;;  %v2208_v32 = vmul.f32 %v2615_v24, %v2128_v12 }
0x2ad8   :  { %v2193_v44 = vpop.permute.xlu1 %2192 }
0x2ad9   :  { %v2195_v45 = vmul.f32 %v2615_v24, %v2193_v44 }
0x2adb   :  { %2197 = vrot.lane.b32.xlu0 %v2195_v45, %s2649_s19 }
0x2adf   :  { %1352 = vrot.lane.b32.xlu0 %v3132_v5, %s2651_s5 }
0x2ae3   :  { %1645 = vrot.lane.b32.xlu0 %v3184_v29, %s2651_s5 }
0x2ae7   :  { %1806 = vrot.lane.b32.xlu0 %v3218_v33, %s2651_s5 }
0x2aeb   :  { %1968 = vrot.lane.b32.xlu0 %v3251_v34, %s2651_s5 }
0x2aef   :  { %2130 = vrot.lane.b32.xlu0 %v2128_v12, %s2651_s5 }
0x2b4d   :  { %v2198_v63 = vpop.permute.xlu0 %2197 }
0x2b4e   :  { %v2200_v46 = vadd.f32 %v2198_v63, %v2135_v55 }
0x2b50   :  { %2616 = vtanh.f32 %v2200_v46 }
0x2b51   :  { %v1353_v30 = vpop.permute.xlu0 %1352 }
0x2b52   :  { %1356 = vst.msk [vmem:[#allocation4] sm:$0x3] %vm1355_vm6, %v1353_v30 }
0x2b55   :  { %v1646_v35 = vpop.permute.xlu0 %1645 }
0x2b56   :  { %1648 = vst.msk [vmem:[%s3360_s12] sm:$0x3] %vm1355_vm6, %v1646_v35 }
0x2b59   :  { %v1807_v5 = vpop.permute.xlu0 %1806 }
0x2b5a   :  { %v2617_v29 = vpop.eup %2616  ;;  %2279 = vst.msk [vmem:[%s3360_s12 + $0x4] sm:$0x3] %vm1355_vm6, %v1807_v5 }
0x2b5b   :  { %2204 = vrot.lane.b32.xlu1 %v2617_v29, %s2651_s5 }
0x2b5d   :  { %v1969_v33 = vpop.permute.xlu0 %1968 }
0x2b5e   :  { %2285 = vst.msk [vmem:[%s3360_s12 + $0x8] sm:$0x3] %vm1355_vm6, %v1969_v33 }
0x2b5f   :  { %1725 = vrot.lane.b32.xlu1 %v3201_v18, %s2651_s5 }
0x2b61   :  { %v2131_v34 = vpop.permute.xlu0 %2130 }
0x2b62   :  { %2291 = vst.msk [vmem:[%s3360_s12 + $0xc] sm:$0x3] %vm1355_vm6, %v2131_v34 }
0x2b63   :  { %1887 = vrot.lane.b32.xlu1 %v3235_v62, %s2651_s5 }
0x2bcd   :  { %v2205_v31 = vpop.permute.xlu1 %2204 }
0x2bce   :  { %v2207_v57 = vmul.f32 %v2205_v31, %v2202_v43 }
0x2bd0   :  { %v2209_v3 = vadd.f32 %v2208_v32, %v2207_v57 }
0x2bd1   :  { %v1726_v17 = vpop.permute.xlu1 %1725 }
0x2bd2   :  { %2276 = vst.msk [vmem:[%s3360_s12 + $0x2] sm:$0x3] %vm1355_vm6, %v1726_v17  ;;  %2211 = vrot.lane.b32.xlu1 %v2209_v3, %s2651_s5 }
0x2bd5   :  { %v1888_v18 = vpop.permute.xlu1 %1887 }
0x2bd6   :  { %2282 = vst.msk [vmem:[%s3360_s12 + $0x6] sm:$0x3] %vm1355_vm6, %v1888_v18  ;;  %2049 = vrot.lane.b32.xlu1 %v3267_v41, %s2651_s5 }
0x2c44   :  { %v2212_v62 = vpop.permute.xlu1 %2211 }
0x2c45   :  { %2294 = vst.msk [vmem:[%s3360_s12 + $0xe] sm:$0x3] %vm1355_vm6, %v2212_v62  ;;  %2217 = vst.msk [vmem:[#allocation4 + $0x2] sm:$0x3] %vm1355_vm6, %v2212_v62 }
0x2c46   :  { %2629 = shalt.err (!%p2626_p4)
}
0x2c47   :  { %s2630_s27 = scalar_lea.hbm %s3361_s13, 64 }
0x2c48   :  { %p2631_p5 = scmp.ne.s32.totalorder %s3361_s13, %s2630_s27  ;;  %p2634_p6 = scmp.lt.u32.totalorder %s2630_s27, %s3361_s13 }
0x2c4a   :  { %p2636_p7 = pnand %p2634_p6, %p2631_p5 }
0x2c4c   :  { %2639 = shalt.err (!%p2636_p7)
}
0x2c4d   :  { %s2654_s8 = smov 2   ;;  %v2050_v4 = vpop.permute.xlu1 %2049 }
0x2c4e   :  { %2231 = dma.vmem_to_hbm [thread:$0]  %s2226_s23, 64, %s3361_s13, [#allocation5], %s2650_s20, %s2650_s20, %s2654_s8  }
0x2c4f   :  { %2288 = vst.msk [vmem:[%s3360_s12 + $0xa] sm:$0x3] %vm1355_vm6, %v2050_v4 }
0x2c50   :  { %2640 = dma.done.wait [#allocation5], 64  }
0x2c51   :  { %2641 = vsyncadd [#allocation5], 4294967232 }
0x2c52   :  { %2237 = vsyncpa [#allocation5], 1 }

</bundles_post_ra>
